<compile_context>
chip_gen: v7x
topology: tpu7x:2x2x1
jax: 0.10.0
libtpu: 0.0.40
codegen_flags: <defaults>
</compile_context>

<pallas_src>
import jax
import jax.numpy as jnp
import numpy as np
from jax.experimental import pallas as pl
from jax.experimental.pallas import tpu as pltpu


# ---------------------------------------------------------------------------
# Static index maps: reflect(pad2) o reflect(pad1) o nearest-upsample
# ---------------------------------------------------------------------------
def _reflect_index(i, size, pad):
    """numpy/PyTorch 'reflect' (no edge repeat); requires pad < size."""
    j = i - pad
    if j < 0:
        j = -j
    if j >= size:
        j = 2 * (size - 1) - j
    return j


def _fused_src_indices(in_size, up, pad1, pad2, req_len):
    """dst index (in the twice-reflect-padded, upsampled axis) -> src index in x.

    Entries past the true padded extent (only needed because of tile padding)
    map to 0; the corresponding outputs are cropped afterwards.
    """
    n1 = in_size * up          # after nearest upsample
    n2 = n1 + 2 * pad1         # after UpSampleBlock's ReflectionPad2d
    n3 = n2 + 2 * pad2         # after ConvLayer's ReflectionPad2d
    idx = np.zeros((req_len,), dtype=np.int32)
    for i in range(req_len):
        if i < n3:
            j = _reflect_index(i, n2, pad2)
            j = _reflect_index(j, n1, pad1)
            idx[i] = j // up
    return idx


# ---------------------------------------------------------------------------
# Pallas kernel: direct conv on the padded image (K*K shifted-window dots)
# ---------------------------------------------------------------------------
def _make_conv_kernel(K, stride, TH, Cout, Wo_pad):
    def kernel(xp_ref, w_ref, out_ref):
        # xp_ref : (Hin_req, Cin, Win_req) bf16 -- whole padded image, one batch
        # w_ref  : (K*K, Cout, Cin)        bf16 -- grid-invariant resident block
        # out_ref: (TH, Cout, Wo_pad)      f32  -- one output row tile
        r0 = pl.program_id(1) * (TH * stride)
        wmats = [w_ref[i] for i in range(K * K)]           # (Cout, Cin) each
        for hl in range(TH):                               # output rows in tile
            acc = jnp.zeros((Cout, Wo_pad), dtype=jnp.float32)
            for kh in range(K):
                slab = xp_ref[r0 + hl * stride + kh]       # (Cin, Win_req)
                for kw in range(K):
                    # TODO(synk): stride > 1 takes a strided lane slice here; the
                    # reference net uses UpSampleBlock only with stride == 1
                    # (contiguous slice path, which is what this script runs).
                    win = slab[:, kw: kw + (Wo_pad - 1) * stride + 1: stride]
                    acc = acc + jnp.dot(wmats[kh * K + kw], win,
                                        preferred_element_type=jnp.float32)
            out_ref[hl] = acc.astype(out_ref.dtype)        # dense (Cout, Wo_pad) store
    return kernel


# ---------------------------------------------------------------------------
# Wrapper: fused gather (upsample + pads) -> Pallas conv -> crop / transpose
# ---------------------------------------------------------------------------
def upsample_block_forward(x, weight, kernel_size, stride, upsample=None,
                           *, row_tile=8, lane_tile=128):
    """x: (N, Cin, H, W) f32 NCHW; weight: (Cout, Cin, K, K). Returns NCHW f32."""
    N, Cin, H, W = x.shape
    Cout = weight.shape[0]
    K = int(kernel_size)
    s = int(stride)
    u = int(upsample) if upsample else 1
    pad1 = K // s              # UpSampleBlock's ReflectionPad2d
    pad2 = K // 2              # ConvLayer's ReflectionPad2d

    H1, W1 = H * u, W * u
    if not (pad1 < H1 and pad1 < W1 and pad2 < H1 + 2 * pad1 and pad2 < W1 + 2 * pad1):
        raise ValueError("reflection padding must be smaller than the input "
                         "(same constraint as nn.ReflectionPad2d)")

    Hp = H1 + 2 * (pad1 + pad2)
    Wp = W1 + 2 * (pad1 + pad2)
    Ho = (Hp - K) // s + 1
    Wo = (Wp - K) // s + 1

    TH = int(row_tile)
    Ho_pad = ((Ho + TH - 1) // TH) * TH                          # row-tile multiple
    Wo_pad = ((Wo + lane_tile - 1) // lane_tile) * lane_tile     # lane-dense (128x)
    Hin_req = (Ho_pad - 1) * s + K
    Win_req = (Wo_pad - 1) * s + K

    src_h = _fused_src_indices(H, u, pad1, pad2, Hin_req)
    src_w = _fused_src_indices(W, u, pad1, pad2, Win_req)

    # Fused upsample + double reflection pad as pure index gathers, then one
    # transpose+cast so every image row is a contiguous (Cin, Win_req) slab for
    # the kernel.  No repeat / pad / im2col materialisation.
    xg = jnp.take(x, jnp.asarray(src_h), axis=2)                 # (N, Cin, Hin_req, W)
    xg = jnp.take(xg, jnp.asarray(src_w), axis=3)                # (N, Cin, Hin_req, Win_req)
    xp = jnp.transpose(xg, (0, 2, 1, 3)).astype(jnp.bfloat16)    # (N, Hin_req, Cin, Win_req)

    # (Cout, Cin, K, K) -> (K*K, Cout, Cin): one (Cout, Cin) matrix per tap.
    w_r = jnp.transpose(weight, (2, 3, 0, 1)).reshape(K * K, Cout, Cin)
    w_r = w_r.astype(jnp.bfloat16)

    grid = (N, Ho_pad // TH)
    flops = 2 * N * Ho_pad * Wo_pad * Cout * Cin * K * K
    bytes_accessed = (N * Hin_req * Cin * Win_req * 2
                      + K * K * Cout * Cin * 2
                      + N * Ho_pad * Cout * Wo_pad * 4)

    out = pl.pallas_call(
        _make_conv_kernel(K, s, TH, Cout, Wo_pad),
        out_shape=jax.ShapeDtypeStruct((N, Ho_pad, Cout, Wo_pad), jnp.float32),
        grid_spec=pltpu.PrefetchScalarGridSpec(
            num_scalar_prefetch=0,
            grid=grid,
            in_specs=[
                # Whole padded image per batch: block index depends only on n,
                # so it is DMA'd once per batch and revisited across row tiles.
                pl.BlockSpec((None, Hin_req, Cin, Win_req),
                             lambda n, h: (n, 0, 0, 0)),
                # Grid-invariant resident weights.
                pl.BlockSpec((K * K, Cout, Cin), lambda n, h: (0, 0, 0)),
            ],
            out_specs=pl.BlockSpec((None, TH, Cout, Wo_pad),
                                   lambda n, h: (n, h, 0, 0)),
        ),
        compiler_params=pltpu.CompilerParams(
            dimension_semantics=("parallel", "parallel"),
            vmem_limit_bytes=32 * 1024 * 1024,
        ),
        cost_estimate=pl.CostEstimate(flops=flops, transcendentals=0,
                                      bytes_accessed=bytes_accessed),
    )(xp, w_r)

    # (N, Ho_pad, Cout, Wo_pad) -> crop tile padding -> NCHW
    return jnp.transpose(out[:, :Ho, :, :Wo], (0, 2, 1, 3))


# ---------------------------------------------------------------------------
if __name__ == "__main__":
    # UpSampleBlock(in_channel=8, out_channel=16, kernel_size=3, stride=1, upsample=2)
    N, Cin, H, W = 2, 8, 16, 16
    Cout, K, stride, upsample = 16, 3, 1, 2

    key = jax.random.PRNGKey(0)
    kx, kw = jax.random.split(key)
    x = jax.random.normal(kx, (N, Cin, H, W), dtype=jnp.float32)
    weight = 0.1 * jax.random.normal(kw, (Cout, Cin, K, K), dtype=jnp.float32)

    fwd = jax.jit(upsample_block_forward, static_argnums=(2, 3, 4))
    y = jax.block_until_ready(fwd(x, weight, K, stride, upsample))

    # Reference: same upsample / double-reflect-pad pipeline in f32, conv by XLA.
    x_up = jnp.repeat(jnp.repeat(x, upsample, axis=2), upsample, axis=3)
    p1, p2 = K // stride, K // 2
    x_pad = jnp.pad(x_up, ((0, 0), (0, 0), (p1, p1), (p1, p1)), mode="reflect")
    x_pad = jnp.pad(x_pad, ((0, 0), (0, 0), (p2, p2), (p2, p2)), mode="reflect")
    y_ref = jax.lax.conv_general_dilated(
        x_pad, weight, window_strides=(stride, stride), padding="VALID",
        dimension_numbers=("NCHW", "OIHW", "NCHW"))

    assert y.shape == y_ref.shape, (y.shape, y_ref.shape)
    # Kernel uses bf16 inputs with f32 accumulation vs a pure-f32 reference.
    np.testing.assert_allclose(np.asarray(y), np.asarray(y_ref), rtol=2e-2, atol=2e-2)

    print("KERNEL_OK")
</pallas_src>

<mosaic_0001>
module attributes {stable_mosaic.version = 11 : i64} {
  func.func @kernel(%arg0: i32, %arg1: i32, %arg2: memref<1x42x8x130xbf16, #tpu.memory_space<vmem>>, %arg3: memref<9x16x8xbf16, #tpu.memory_space<vmem>>, %arg4: memref<1x8x16x128xf32, #tpu.memory_space<vmem>>) attributes {dimension_semantics = [#tpu.dimension_semantics<parallel>, #tpu.dimension_semantics<parallel>], iteration_bounds = array<i64: 2, 5>, scalar_prefetch = 0 : i64, scratch_operands = 0 : i64, tpu.core_type = #tpu.core_type<tc>, window_params = [{transform_indices = @transform_0, window_bounds = array<i64: 1, 42, 8, 130>}, {pipeline_mode = #tpu.pipeline_mode<synchronous>, transform_indices = @transform_1, window_bounds = array<i64: 9, 16, 8>}, {transform_indices = @transform_2, window_bounds = array<i64: 1, 8, 16, 128>}]} {
    %c8_i32 = arith.constant 8 : i32
    %0 = arith.muli %arg1, %c8_i32 : i32
    %c0 = arith.constant 0 : index
    %c0_0 = arith.constant 0 : index
    %c0_1 = arith.constant 0 : index
    %1 = vector.load %arg3[%c0, %c0_0, %c0_1] : memref<9x16x8xbf16, #tpu.memory_space<vmem>>, vector<1x16x8xbf16>
    %2 = vector.shape_cast %1 : vector<1x16x8xbf16> to vector<16x8xbf16>
    %c1 = arith.constant 1 : index
    %c0_2 = arith.constant 0 : index
    %c0_3 = arith.constant 0 : index
    %3 = vector.load %arg3[%c1, %c0_2, %c0_3] : memref<9x16x8xbf16, #tpu.memory_space<vmem>>, vector<1x16x8xbf16>
    %4 = vector.shape_cast %3 : vector<1x16x8xbf16> to vector<16x8xbf16>
    %c2 = arith.constant 2 : index
    %c0_4 = arith.constant 0 : index
    %c0_5 = arith.constant 0 : index
    %5 = vector.load %arg3[%c2, %c0_4, %c0_5] : memref<9x16x8xbf16, #tpu.memory_space<vmem>>, vector<1x16x8xbf16>
    %6 = vector.shape_cast %5 : vector<1x16x8xbf16> to vector<16x8xbf16>
    %c3 = arith.constant 3 : index
    %c0_6 = arith.constant 0 : index
    %c0_7 = arith.constant 0 : index
    %7 = vector.load %arg3[%c3, %c0_6, %c0_7] : memref<9x16x8xbf16, #tpu.memory_space<vmem>>, vector<1x16x8xbf16>
    %8 = vector.shape_cast %7 : vector<1x16x8xbf16> to vector<16x8xbf16>
    %c4 = arith.constant 4 : index
    %c0_8 = arith.constant 0 : index
    %c0_9 = arith.constant 0 : index
    %9 = vector.load %arg3[%c4, %c0_8, %c0_9] : memref<9x16x8xbf16, #tpu.memory_space<vmem>>, vector<1x16x8xbf16>
    %10 = vector.shape_cast %9 : vector<1x16x8xbf16> to vector<16x8xbf16>
    %c5 = arith.constant 5 : index
    %c0_10 = arith.constant 0 : index
    %c0_11 = arith.constant 0 : index
    %11 = vector.load %arg3[%c5, %c0_10, %c0_11] : memref<9x16x8xbf16, #tpu.memory_space<vmem>>, vector<1x16x8xbf16>
    %12 = vector.shape_cast %11 : vector<1x16x8xbf16> to vector<16x8xbf16>
    %c6 = arith.constant 6 : index
    %c0_12 = arith.constant 0 : index
    %c0_13 = arith.constant 0 : index
    %13 = vector.load %arg3[%c6, %c0_12, %c0_13] : memref<9x16x8xbf16, #tpu.memory_space<vmem>>, vector<1x16x8xbf16>
    %14 = vector.shape_cast %13 : vector<1x16x8xbf16> to vector<16x8xbf16>
    %c7 = arith.constant 7 : index
    %c0_14 = arith.constant 0 : index
    %c0_15 = arith.constant 0 : index
    %15 = vector.load %arg3[%c7, %c0_14, %c0_15] : memref<9x16x8xbf16, #tpu.memory_space<vmem>>, vector<1x16x8xbf16>
    %16 = vector.shape_cast %15 : vector<1x16x8xbf16> to vector<16x8xbf16>
    %c8 = arith.constant 8 : index
    %c0_16 = arith.constant 0 : index
    %c0_17 = arith.constant 0 : index
    %17 = vector.load %arg3[%c8, %c0_16, %c0_17] : memref<9x16x8xbf16, #tpu.memory_space<vmem>>, vector<1x16x8xbf16>
    %18 = vector.shape_cast %17 : vector<1x16x8xbf16> to vector<16x8xbf16>
    %cst = arith.constant 0.000000e+00 : f32
    %19 = vector.broadcast %cst : f32 to vector<16x128xf32>
    %c0_i32 = arith.constant 0 : i32
    %20 = arith.addi %0, %c0_i32 : i32
    %c0_i32_18 = arith.constant 0 : i32
    %21 = arith.addi %20, %c0_i32_18 : i32
    %c0_19 = arith.constant 0 : index
    %22 = arith.index_cast %21 : i32 to index
    %c0_20 = arith.constant 0 : index
    %c0_21 = arith.constant 0 : index
    %23 = vector.load %arg2[%c0_19, %22, %c0_20, %c0_21] : memref<1x42x8x130xbf16, #tpu.memory_space<vmem>>, vector<1x1x8x130xbf16>
    %24 = vector.shape_cast %23 : vector<1x1x8x130xbf16> to vector<8x130xbf16>
    %25 = vector.extract_strided_slice %24 {offsets = [0, 0], sizes = [8, 128], strides = [1, 1]} : vector<8x130xbf16> to vector<8x128xbf16>
    %cst_22 = arith.constant dense<0.000000e+00> : vector<16x128xf32>
    %26 = tpu.matmul %2, %25, %cst_22 {dimension_numbers = #tpu.dot_dimension_numbers<[1], [0], [0], [1], [0, 0, 1, 1], [], []>} : vector<16x8xbf16>, vector<8x128xbf16>, vector<16x128xf32> -> vector<16x128xf32>
    %27 = arith.addf %19, %26 : vector<16x128xf32>
    %28 = vector.extract_strided_slice %24 {offsets = [0, 1], sizes = [8, 128], strides = [1, 1]} : vector<8x130xbf16> to vector<8x128xbf16>
    %cst_23 = arith.constant dense<0.000000e+00> : vector<16x128xf32>
    %29 = tpu.matmul %4, %28, %cst_23 {dimension_numbers = #tpu.dot_dimension_numbers<[1], [0], [0], [1], [0, 0, 1, 1], [], []>} : vector<16x8xbf16>, vector<8x128xbf16>, vector<16x128xf32> -> vector<16x128xf32>
    %30 = arith.addf %27, %29 : vector<16x128xf32>
    %31 = vector.extract_strided_slice %24 {offsets = [0, 2], sizes = [8, 128], strides = [1, 1]} : vector<8x130xbf16> to vector<8x128xbf16>
    %cst_24 = arith.constant dense<0.000000e+00> : vector<16x128xf32>
    %32 = tpu.matmul %6, %31, %cst_24 {dimension_numbers = #tpu.dot_dimension_numbers<[1], [0], [0], [1], [0, 0, 1, 1], [], []>} : vector<16x8xbf16>, vector<8x128xbf16>, vector<16x128xf32> -> vector<16x128xf32>
    %33 = arith.addf %30, %32 : vector<16x128xf32>
    %c0_i32_25 = arith.constant 0 : i32
    %34 = arith.addi %0, %c0_i32_25 : i32
    %c1_i32 = arith.constant 1 : i32
    %35 = arith.addi %34, %c1_i32 : i32
    %c0_26 = arith.constant 0 : index
    %36 = arith.index_cast %35 : i32 to index
    %c0_27 = arith.constant 0 : index
    %c0_28 = arith.constant 0 : index
    %37 = vector.load %arg2[%c0_26, %36, %c0_27, %c0_28] : memref<1x42x8x130xbf16, #tpu.memory_space<vmem>>, vector<1x1x8x130xbf16>
    %38 = vector.shape_cast %37 : vector<1x1x8x130xbf16> to vector<8x130xbf16>
    %39 = vector.extract_strided_slice %38 {offsets = [0, 0], sizes = [8, 128], strides = [1, 1]} : vector<8x130xbf16> to vector<8x128xbf16>
    %cst_29 = arith.constant dense<0.000000e+00> : vector<16x128xf32>
    %40 = tpu.matmul %8, %39, %cst_29 {dimension_numbers = #tpu.dot_dimension_numbers<[1], [0], [0], [1], [0, 0, 1, 1], [], []>} : vector<16x8xbf16>, vector<8x128xbf16>, vector<16x128xf32> -> vector<16x128xf32>
    %41 = arith.addf %33, %40 : vector<16x128xf32>
    %42 = vector.extract_strided_slice %38 {offsets = [0, 1], sizes = [8, 128], strides = [1, 1]} : vector<8x130xbf16> to vector<8x128xbf16>
    %cst_30 = arith.constant dense<0.000000e+00> : vector<16x128xf32>
    %43 = tpu.matmul %10, %42, %cst_30 {dimension_numbers = #tpu.dot_dimension_numbers<[1], [0], [0], [1], [0, 0, 1, 1], [], []>} : vector<16x8xbf16>, vector<8x128xbf16>, vector<16x128xf32> -> vector<16x128xf32>
    %44 = arith.addf %41, %43 : vector<16x128xf32>
    %45 = vector.extract_strided_slice %38 {offsets = [0, 2], sizes = [8, 128], strides = [1, 1]} : vector<8x130xbf16> to vector<8x128xbf16>
    %cst_31 = arith.constant dense<0.000000e+00> : vector<16x128xf32>
    %46 = tpu.matmul %12, %45, %cst_31 {dimension_numbers = #tpu.dot_dimension_numbers<[1], [0], [0], [1], [0, 0, 1, 1], [], []>} : vector<16x8xbf16>, vector<8x128xbf16>, vector<16x128xf32> -> vector<16x128xf32>
    %47 = arith.addf %44, %46 : vector<16x128xf32>
    %c0_i32_32 = arith.constant 0 : i32
    %48 = arith.addi %0, %c0_i32_32 : i32
    %c2_i32 = arith.constant 2 : i32
    %49 = arith.addi %48, %c2_i32 : i32
    %c0_33 = arith.constant 0 : index
    %50 = arith.index_cast %49 : i32 to index
    %c0_34 = arith.constant 0 : index
    %c0_35 = arith.constant 0 : index
    %51 = vector.load %arg2[%c0_33, %50, %c0_34, %c0_35] : memref<1x42x8x130xbf16, #tpu.memory_space<vmem>>, vector<1x1x8x130xbf16>
    %52 = vector.shape_cast %51 : vector<1x1x8x130xbf16> to vector<8x130xbf16>
    %53 = vector.extract_strided_slice %52 {offsets = [0, 0], sizes = [8, 128], strides = [1, 1]} : vector<8x130xbf16> to vector<8x128xbf16>
    %cst_36 = arith.constant dense<0.000000e+00> : vector<16x128xf32>
    %54 = tpu.matmul %14, %53, %cst_36 {dimension_numbers = #tpu.dot_dimension_numbers<[1], [0], [0], [1], [0, 0, 1, 1], [], []>} : vector<16x8xbf16>, vector<8x128xbf16>, vector<16x128xf32> -> vector<16x128xf32>
    %55 = arith.addf %47, %54 : vector<16x128xf32>
    %56 = vector.extract_strided_slice %52 {offsets = [0, 1], sizes = [8, 128], strides = [1, 1]} : vector<8x130xbf16> to vector<8x128xbf16>
    %cst_37 = arith.constant dense<0.000000e+00> : vector<16x128xf32>
    %57 = tpu.matmul %16, %56, %cst_37 {dimension_numbers = #tpu.dot_dimension_numbers<[1], [0], [0], [1], [0, 0, 1, 1], [], []>} : vector<16x8xbf16>, vector<8x128xbf16>, vector<16x128xf32> -> vector<16x128xf32>
    %58 = arith.addf %55, %57 : vector<16x128xf32>
    %59 = vector.extract_strided_slice %52 {offsets = [0, 2], sizes = [8, 128], strides = [1, 1]} : vector<8x130xbf16> to vector<8x128xbf16>
    %cst_38 = arith.constant dense<0.000000e+00> : vector<16x128xf32>
    %60 = tpu.matmul %18, %59, %cst_38 {dimension_numbers = #tpu.dot_dimension_numbers<[1], [0], [0], [1], [0, 0, 1, 1], [], []>} : vector<16x8xbf16>, vector<8x128xbf16>, vector<16x128xf32> -> vector<16x128xf32>
    %61 = arith.addf %58, %60 : vector<16x128xf32>
    %c0_39 = arith.constant 0 : index
    %c0_40 = arith.constant 0 : index
    %c0_41 = arith.constant 0 : index
    %c0_42 = arith.constant 0 : index
    %62 = vector.load %arg4[%c0_39, %c0_40, %c0_41, %c0_42] : memref<1x8x16x128xf32, #tpu.memory_space<vmem>>, vector<1x1x16x128xf32>
    %63 = vector.shape_cast %62 : vector<1x1x16x128xf32> to vector<16x128xf32>
    %64 = vector.shape_cast %61 : vector<16x128xf32> to vector<1x1x16x128xf32>
    tpu.vector_store %arg4[%c0_39, %c0_40, %c0_41, %c0_42], %64 {strides = array<i32>} : memref<1x8x16x128xf32, #tpu.memory_space<vmem>>, vector<1x1x16x128xf32>,
    %cst_43 = arith.constant 0.000000e+00 : f32
    %65 = vector.broadcast %cst_43 : f32 to vector<16x128xf32>
    %c1_i32_44 = arith.constant 1 : i32
    %66 = arith.addi %0, %c1_i32_44 : i32
    %c0_i32_45 = arith.constant 0 : i32
    %67 = arith.addi %66, %c0_i32_45 : i32
    %c0_46 = arith.constant 0 : index
    %68 = arith.index_cast %67 : i32 to index
    %c0_47 = arith.constant 0 : index
    %c0_48 = arith.constant 0 : index
    %69 = vector.load %arg2[%c0_46, %68, %c0_47, %c0_48] : memref<1x42x8x130xbf16, #tpu.memory_space<vmem>>, vector<1x1x8x130xbf16>
    %70 = vector.shape_cast %69 : vector<1x1x8x130xbf16> to vector<8x130xbf16>
    %71 = vector.extract_strided_slice %70 {offsets = [0, 0], sizes = [8, 128], strides = [1, 1]} : vector<8x130xbf16> to vector<8x128xbf16>
    %cst_49 = arith.constant dense<0.000000e+00> : vector<16x128xf32>
    %72 = tpu.matmul %2, %71, %cst_49 {dimension_numbers = #tpu.dot_dimension_numbers<[1], [0], [0], [1], [0, 0, 1, 1], [], []>} : vector<16x8xbf16>, vector<8x128xbf16>, vector<16x128xf32> -> vector<16x128xf32>
    %73 = arith.addf %65, %72 : vector<16x128xf32>
    %74 = vector.extract_strided_slice %70 {offsets = [0, 1], sizes = [8, 128], strides = [1, 1]} : vector<8x130xbf16> to vector<8x128xbf16>
    %cst_50 = arith.constant dense<0.000000e+00> : vector<16x128xf32>
    %75 = tpu.matmul %4, %74, %cst_50 {dimension_numbers = #tpu.dot_dimension_numbers<[1], [0], [0], [1], [0, 0, 1, 1], [], []>} : vector<16x8xbf16>, vector<8x128xbf16>, vector<16x128xf32> -> vector<16x128xf32>
    %76 = arith.addf %73, %75 : vector<16x128xf32>
    %77 = vector.extract_strided_slice %70 {offsets = [0, 2], sizes = [8, 128], strides = [1, 1]} : vector<8x130xbf16> to vector<8x128xbf16>
    %cst_51 = arith.constant dense<0.000000e+00> : vector<16x128xf32>
    %78 = tpu.matmul %6, %77, %cst_51 {dimension_numbers = #tpu.dot_dimension_numbers<[1], [0], [0], [1], [0, 0, 1, 1], [], []>} : vector<16x8xbf16>, vector<8x128xbf16>, vector<16x128xf32> -> vector<16x128xf32>
    %79 = arith.addf %76, %78 : vector<16x128xf32>
    %c1_i32_52 = arith.constant 1 : i32
    %80 = arith.addi %0, %c1_i32_52 : i32
    %c1_i32_53 = arith.constant 1 : i32
    %81 = arith.addi %80, %c1_i32_53 : i32
    %c0_54 = arith.constant 0 : index
    %82 = arith.index_cast %81 : i32 to index
    %c0_55 = arith.constant 0 : index
    %c0_56 = arith.constant 0 : index
    %83 = vector.load %arg2[%c0_54, %82, %c0_55, %c0_56] : memref<1x42x8x130xbf16, #tpu.memory_space<vmem>>, vector<1x1x8x130xbf16>
    %84 = vector.shape_cast %83 : vector<1x1x8x130xbf16> to vector<8x130xbf16>
    %85 = vector.extract_strided_slice %84 {offsets = [0, 0], sizes = [8, 128], strides = [1, 1]} : vector<8x130xbf16> to vector<8x128xbf16>
    %cst_57 = arith.constant dense<0.000000e+00> : vector<16x128xf32>
    %86 = tpu.matmul %8, %85, %cst_57 {dimension_numbers = #tpu.dot_dimension_numbers<[1], [0], [0], [1], [0, 0, 1, 1], [], []>} : vector<16x8xbf16>, vector<8x128xbf16>, vector<16x128xf32> -> vector<16x128xf32>
    %87 = arith.addf %79, %86 : vector<16x128xf32>
    %88 = vector.extract_strided_slice %84 {offsets = [0, 1], sizes = [8, 128], strides = [1, 1]} : vector<8x130xbf16> to vector<8x128xbf16>
    %cst_58 = arith.constant dense<0.000000e+00> : vector<16x128xf32>
    %89 = tpu.matmul %10, %88, %cst_58 {dimension_numbers = #tpu.dot_dimension_numbers<[1], [0], [0], [1], [0, 0, 1, 1], [], []>} : vector<16x8xbf16>, vector<8x128xbf16>, vector<16x128xf32> -> vector<16x128xf32>
    %90 = arith.addf %87, %89 : vector<16x128xf32>
    %91 = vector.extract_strided_slice %84 {offsets = [0, 2], sizes = [8, 128], strides = [1, 1]} : vector<8x130xbf16> to vector<8x128xbf16>
    %cst_59 = arith.constant dense<0.000000e+00> : vector<16x128xf32>
    %92 = tpu.matmul %12, %91, %cst_59 {dimension_numbers = #tpu.dot_dimension_numbers<[1], [0], [0], [1], [0, 0, 1, 1], [], []>} : vector<16x8xbf16>, vector<8x128xbf16>, vector<16x128xf32> -> vector<16x128xf32>
    %93 = arith.addf %90, %92 : vector<16x128xf32>
    %c1_i32_60 = arith.constant 1 : i32
    %94 = arith.addi %0, %c1_i32_60 : i32
    %c2_i32_61 = arith.constant 2 : i32
    %95 = arith.addi %94, %c2_i32_61 : i32
    %c0_62 = arith.constant 0 : index
    %96 = arith.index_cast %95 : i32 to index
    %c0_63 = arith.constant 0 : index
    %c0_64 = arith.constant 0 : index
    %97 = vector.load %arg2[%c0_62, %96, %c0_63, %c0_64] : memref<1x42x8x130xbf16, #tpu.memory_space<vmem>>, vector<1x1x8x130xbf16>
    %98 = vector.shape_cast %97 : vector<1x1x8x130xbf16> to vector<8x130xbf16>
    %99 = vector.extract_strided_slice %98 {offsets = [0, 0], sizes = [8, 128], strides = [1, 1]} : vector<8x130xbf16> to vector<8x128xbf16>
    %cst_65 = arith.constant dense<0.000000e+00> : vector<16x128xf32>
    %100 = tpu.matmul %14, %99, %cst_65 {dimension_numbers = #tpu.dot_dimension_numbers<[1], [0], [0], [1], [0, 0, 1, 1], [], []>} : vector<16x8xbf16>, vector<8x128xbf16>, vector<16x128xf32> -> vector<16x128xf32>
    %101 = arith.addf %93, %100 : vector<16x128xf32>
    %102 = vector.extract_strided_slice %98 {offsets = [0, 1], sizes = [8, 128], strides = [1, 1]} : vector<8x130xbf16> to vector<8x128xbf16>
    %cst_66 = arith.constant dense<0.000000e+00> : vector<16x128xf32>
    %103 = tpu.matmul %16, %102, %cst_66 {dimension_numbers = #tpu.dot_dimension_numbers<[1], [0], [0], [1], [0, 0, 1, 1], [], []>} : vector<16x8xbf16>, vector<8x128xbf16>, vector<16x128xf32> -> vector<16x128xf32>
    %104 = arith.addf %101, %103 : vector<16x128xf32>
    %105 = vector.extract_strided_slice %98 {offsets = [0, 2], sizes = [8, 128], strides = [1, 1]} : vector<8x130xbf16> to vector<8x128xbf16>
    %cst_67 = arith.constant dense<0.000000e+00> : vector<16x128xf32>
    %106 = tpu.matmul %18, %105, %cst_67 {dimension_numbers = #tpu.dot_dimension_numbers<[1], [0], [0], [1], [0, 0, 1, 1], [], []>} : vector<16x8xbf16>, vector<8x128xbf16>, vector<16x128xf32> -> vector<16x128xf32>
    %107 = arith.addf %104, %106 : vector<16x128xf32>
    %c0_68 = arith.constant 0 : index
    %c1_69 = arith.constant 1 : index
    %c0_70 = arith.constant 0 : index
    %c0_71 = arith.constant 0 : index
    %108 = vector.load %arg4[%c0_68, %c1_69, %c0_70, %c0_71] : memref<1x8x16x128xf32, #tpu.memory_space<vmem>>, vector<1x1x16x128xf32>
    %109 = vector.shape_cast %108 : vector<1x1x16x128xf32> to vector<16x128xf32>
    %110 = vector.shape_cast %107 : vector<16x128xf32> to vector<1x1x16x128xf32>
    tpu.vector_store %arg4[%c0_68, %c1_69, %c0_70, %c0_71], %110 {strides = array<i32>} : memref<1x8x16x128xf32, #tpu.memory_space<vmem>>, vector<1x1x16x128xf32>,
    %cst_72 = arith.constant 0.000000e+00 : f32
    %111 = vector.broadcast %cst_72 : f32 to vector<16x128xf32>
    %c2_i32_73 = arith.constant 2 : i32
    %112 = arith.addi %0, %c2_i32_73 : i32
    %c0_i32_74 = arith.constant 0 : i32
    %113 = arith.addi %112, %c0_i32_74 : i32
    %c0_75 = arith.constant 0 : index
    %114 = arith.index_cast %113 : i32 to index
    %c0_76 = arith.constant 0 : index
    %c0_77 = arith.constant 0 : index
    %115 = vector.load %arg2[%c0_75, %114, %c0_76, %c0_77] : memref<1x42x8x130xbf16, #tpu.memory_space<vmem>>, vector<1x1x8x130xbf16>
    %116 = vector.shape_cast %115 : vector<1x1x8x130xbf16> to vector<8x130xbf16>
    %117 = vector.extract_strided_slice %116 {offsets = [0, 0], sizes = [8, 128], strides = [1, 1]} : vector<8x130xbf16> to vector<8x128xbf16>
    %cst_78 = arith.constant dense<0.000000e+00> : vector<16x128xf32>
    %118 = tpu.matmul %2, %117, %cst_78 {dimension_numbers = #tpu.dot_dimension_numbers<[1], [0], [0], [1], [0, 0, 1, 1], [], []>} : vector<16x8xbf16>, vector<8x128xbf16>, vector<16x128xf32> -> vector<16x128xf32>
    %119 = arith.addf %111, %118 : vector<16x128xf32>
    %120 = vector.extract_strided_slice %116 {offsets = [0, 1], sizes = [8, 128], strides = [1, 1]} : vector<8x130xbf16> to vector<8x128xbf16>
    %cst_79 = arith.constant dense<0.000000e+00> : vector<16x128xf32>
    %121 = tpu.matmul %4, %120, %cst_79 {dimension_numbers = #tpu.dot_dimension_numbers<[1], [0], [0], [1], [0, 0, 1, 1], [], []>} : vector<16x8xbf16>, vector<8x128xbf16>, vector<16x128xf32> -> vector<16x128xf32>
    %122 = arith.addf %119, %121 : vector<16x128xf32>
    %123 = vector.extract_strided_slice %116 {offsets = [0, 2], sizes = [8, 128], strides = [1, 1]} : vector<8x130xbf16> to vector<8x128xbf16>
    %cst_80 = arith.constant dense<0.000000e+00> : vector<16x128xf32>
    %124 = tpu.matmul %6, %123, %cst_80 {dimension_numbers = #tpu.dot_dimension_numbers<[1], [0], [0], [1], [0, 0, 1, 1], [], []>} : vector<16x8xbf16>, vector<8x128xbf16>, vector<16x128xf32> -> vector<16x128xf32>
    %125 = arith.addf %122, %124 : vector<16x128xf32>
    %c2_i32_81 = arith.constant 2 : i32
    %126 = arith.addi %0, %c2_i32_81 : i32
    %c1_i32_82 = arith.constant 1 : i32
    %127 = arith.addi %126, %c1_i32_82 : i32
    %c0_83 = arith.constant 0 : index
    %128 = arith.index_cast %127 : i32 to index
    %c0_84 = arith.constant 0 : index
    %c0_85 = arith.constant 0 : index
    %129 = vector.load %arg2[%c0_83, %128, %c0_84, %c0_85] : memref<1x42x8x130xbf16, #tpu.memory_space<vmem>>, vector<1x1x8x130xbf16>
    %130 = vector.shape_cast %129 : vector<1x1x8x130xbf16> to vector<8x130xbf16>
    %131 = vector.extract_strided_slice %130 {offsets = [0, 0], sizes = [8, 128], strides = [1, 1]} : vector<8x130xbf16> to vector<8x128xbf16>
    %cst_86 = arith.constant dense<0.000000e+00> : vector<16x128xf32>
    %132 = tpu.matmul %8, %131, %cst_86 {dimension_numbers = #tpu.dot_dimension_numbers<[1], [0], [0], [1], [0, 0, 1, 1], [], []>} : vector<16x8xbf16>, vector<8x128xbf16>, vector<16x128xf32> -> vector<16x128xf32>
    %133 = arith.addf %125, %132 : vector<16x128xf32>
    %134 = vector.extract_strided_slice %130 {offsets = [0, 1], sizes = [8, 128], strides = [1, 1]} : vector<8x130xbf16> to vector<8x128xbf16>
    %cst_87 = arith.constant dense<0.000000e+00> : vector<16x128xf32>
    %135 = tpu.matmul %10, %134, %cst_87 {dimension_numbers = #tpu.dot_dimension_numbers<[1], [0], [0], [1], [0, 0, 1, 1], [], []>} : vector<16x8xbf16>, vector<8x128xbf16>, vector<16x128xf32> -> vector<16x128xf32>
    %136 = arith.addf %133, %135 : vector<16x128xf32>
    %137 = vector.extract_strided_slice %130 {offsets = [0, 2], sizes = [8, 128], strides = [1, 1]} : vector<8x130xbf16> to vector<8x128xbf16>
    %cst_88 = arith.constant dense<0.000000e+00> : vector<16x128xf32>
    %138 = tpu.matmul %12, %137, %cst_88 {dimension_numbers = #tpu.dot_dimension_numbers<[1], [0], [0], [1], [0, 0, 1, 1], [], []>} : vector<16x8xbf16>, vector<8x128xbf16>, vector<16x128xf32> -> vector<16x128xf32>
    %139 = arith.addf %136, %138 : vector<16x128xf32>
    %c2_i32_89 = arith.constant 2 : i32
    %140 = arith.addi %0, %c2_i32_89 : i32
    %c2_i32_90 = arith.constant 2 : i32
    %141 = arith.addi %140, %c2_i32_90 : i32
    %c0_91 = arith.constant 0 : index
    %142 = arith.index_cast %141 : i32 to index
    %c0_92 = arith.constant 0 : index
    %c0_93 = arith.constant 0 : index
    %143 = vector.load %arg2[%c0_91, %142, %c0_92, %c0_93] : memref<1x42x8x130xbf16, #tpu.memory_space<vmem>>, vector<1x1x8x130xbf16>
    %144 = vector.shape_cast %143 : vector<1x1x8x130xbf16> to vector<8x130xbf16>
    %145 = vector.extract_strided_slice %144 {offsets = [0, 0], sizes = [8, 128], strides = [1, 1]} : vector<8x130xbf16> to vector<8x128xbf16>
    %cst_94 = arith.constant dense<0.000000e+00> : vector<16x128xf32>
    %146 = tpu.matmul %14, %145, %cst_94 {dimension_numbers = #tpu.dot_dimension_numbers<[1], [0], [0], [1], [0, 0, 1, 1], [], []>} : vector<16x8xbf16>, vector<8x128xbf16>, vector<16x128xf32> -> vector<16x128xf32>
    %147 = arith.addf %139, %146 : vector<16x128xf32>
    %148 = vector.extract_strided_slice %144 {offsets = [0, 1], sizes = [8, 128], strides = [1, 1]} : vector<8x130xbf16> to vector<8x128xbf16>
    %cst_95 = arith.constant dense<0.000000e+00> : vector<16x128xf32>
    %149 = tpu.matmul %16, %148, %cst_95 {dimension_numbers = #tpu.dot_dimension_numbers<[1], [0], [0], [1], [0, 0, 1, 1], [], []>} : vector<16x8xbf16>, vector<8x128xbf16>, vector<16x128xf32> -> vector<16x128xf32>
    %150 = arith.addf %147, %149 : vector<16x128xf32>
    %151 = vector.extract_strided_slice %144 {offsets = [0, 2], sizes = [8, 128], strides = [1, 1]} : vector<8x130xbf16> to vector<8x128xbf16>
    %cst_96 = arith.constant dense<0.000000e+00> : vector<16x128xf32>
    %152 = tpu.matmul %18, %151, %cst_96 {dimension_numbers = #tpu.dot_dimension_numbers<[1], [0], [0], [1], [0, 0, 1, 1], [], []>} : vector<16x8xbf16>, vector<8x128xbf16>, vector<16x128xf32> -> vector<16x128xf32>
    %153 = arith.addf %150, %152 : vector<16x128xf32>
    %c0_97 = arith.constant 0 : index
    %c2_98 = arith.constant 2 : index
    %c0_99 = arith.constant 0 : index
    %c0_100 = arith.constant 0 : index
    %154 = vector.load %arg4[%c0_97, %c2_98, %c0_99, %c0_100] : memref<1x8x16x128xf32, #tpu.memory_space<vmem>>, vector<1x1x16x128xf32>
    %155 = vector.shape_cast %154 : vector<1x1x16x128xf32> to vector<16x128xf32>
    %156 = vector.shape_cast %153 : vector<16x128xf32> to vector<1x1x16x128xf32>
    tpu.vector_store %arg4[%c0_97, %c2_98, %c0_99, %c0_100], %156 {strides = array<i32>} : memref<1x8x16x128xf32, #tpu.memory_space<vmem>>, vector<1x1x16x128xf32>,
    %cst_101 = arith.constant 0.000000e+00 : f32
    %157 = vector.broadcast %cst_101 : f32 to vector<16x128xf32>
    %c3_i32 = arith.constant 3 : i32
    %158 = arith.addi %0, %c3_i32 : i32
    %c0_i32_102 = arith.constant 0 : i32
    %159 = arith.addi %158, %c0_i32_102 : i32
    %c0_103 = arith.constant 0 : index
    %160 = arith.index_cast %159 : i32 to index
    %c0_104 = arith.constant 0 : index
    %c0_105 = arith.constant 0 : index
    %161 = vector.load %arg2[%c0_103, %160, %c0_104, %c0_105] : memref<1x42x8x130xbf16, #tpu.memory_space<vmem>>, vector<1x1x8x130xbf16>
    %162 = vector.shape_cast %161 : vector<1x1x8x130xbf16> to vector<8x130xbf16>
    %163 = vector.extract_strided_slice %162 {offsets = [0, 0], sizes = [8, 128], strides = [1, 1]} : vector<8x130xbf16> to vector<8x128xbf16>
    %cst_106 = arith.constant dense<0.000000e+00> : vector<16x128xf32>
    %164 = tpu.matmul %2, %163, %cst_106 {dimension_numbers = #tpu.dot_dimension_numbers<[1], [0], [0], [1], [0, 0, 1, 1], [], []>} : vector<16x8xbf16>, vector<8x128xbf16>, vector<16x128xf32> -> vector<16x128xf32>
    %165 = arith.addf %157, %164 : vector<16x128xf32>
    %166 = vector.extract_strided_slice %162 {offsets = [0, 1], sizes = [8, 128], strides = [1, 1]} : vector<8x130xbf16> to vector<8x128xbf16>
    %cst_107 = arith.constant dense<0.000000e+00> : vector<16x128xf32>
    %167 = tpu.matmul %4, %166, %cst_107 {dimension_numbers = #tpu.dot_dimension_numbers<[1], [0], [0], [1], [0, 0, 1, 1], [], []>} : vector<16x8xbf16>, vector<8x128xbf16>, vector<16x128xf32> -> vector<16x128xf32>
    %168 = arith.addf %165, %167 : vector<16x128xf32>
    %169 = vector.extract_strided_slice %162 {offsets = [0, 2], sizes = [8, 128], strides = [1, 1]} : vector<8x130xbf16> to vector<8x128xbf16>
    %cst_108 = arith.constant dense<0.000000e+00> : vector<16x128xf32>
    %170 = tpu.matmul %6, %169, %cst_108 {dimension_numbers = #tpu.dot_dimension_numbers<[1], [0], [0], [1], [0, 0, 1, 1], [], []>} : vector<16x8xbf16>, vector<8x128xbf16>, vector<16x128xf32> -> vector<16x128xf32>
    %171 = arith.addf %168, %170 : vector<16x128xf32>
    %c3_i32_109 = arith.constant 3 : i32
    %172 = arith.addi %0, %c3_i32_109 : i32
    %c1_i32_110 = arith.constant 1 : i32
    %173 = arith.addi %172, %c1_i32_110 : i32
    %c0_111 = arith.constant 0 : index
    %174 = arith.index_cast %173 : i32 to index
    %c0_112 = arith.constant 0 : index
    %c0_113 = arith.constant 0 : index
    %175 = vector.load %arg2[%c0_111, %174, %c0_112, %c0_113] : memref<1x42x8x130xbf16, #tpu.memory_space<vmem>>, vector<1x1x8x130xbf16>
    %176 = vector.shape_cast %175 : vector<1x1x8x130xbf16> to vector<8x130xbf16>
    %177 = vector.extract_strided_slice %176 {offsets = [0, 0], sizes = [8, 128], strides = [1, 1]} : vector<8x130xbf16> to vector<8x128xbf16>
    %cst_114 = arith.constant dense<0.000000e+00> : vector<16x128xf32>
    %178 = tpu.matmul %8, %177, %cst_114 {dimension_numbers = #tpu.dot_dimension_numbers<[1], [0], [0], [1], [0, 0, 1, 1], [], []>} : vector<16x8xbf16>, vector<8x128xbf16>, vector<16x128xf32> -> vector<16x128xf32>
    %179 = arith.addf %171, %178 : vector<16x128xf32>
    %180 = vector.extract_strided_slice %176 {offsets = [0, 1], sizes = [8, 128], strides = [1, 1]} : vector<8x130xbf16> to vector<8x128xbf16>
    %cst_115 = arith.constant dense<0.000000e+00> : vector<16x128xf32>
    %181 = tpu.matmul %10, %180, %cst_115 {dimension_numbers = #tpu.dot_dimension_numbers<[1], [0], [0], [1], [0, 0, 1, 1], [], []>} : vector<16x8xbf16>, vector<8x128xbf16>, vector<16x128xf32> -> vector<16x128xf32>
    %182 = arith.addf %179, %181 : vector<16x128xf32>
    %183 = vector.extract_strided_slice %176 {offsets = [0, 2], sizes = [8, 128], strides = [1, 1]} : vector<8x130xbf16> to vector<8x128xbf16>
    %cst_116 = arith.constant dense<0.000000e+00> : vector<16x128xf32>
    %184 = tpu.matmul %12, %183, %cst_116 {dimension_numbers = #tpu.dot_dimension_numbers<[1], [0], [0], [1], [0, 0, 1, 1], [], []>} : vector<16x8xbf16>, vector<8x128xbf16>, vector<16x128xf32> -> vector<16x128xf32>
    %185 = arith.addf %182, %184 : vector<16x128xf32>
    %c3_i32_117 = arith.constant 3 : i32
    %186 = arith.addi %0, %c3_i32_117 : i32
    %c2_i32_118 = arith.constant 2 : i32
    %187 = arith.addi %186, %c2_i32_118 : i32
    %c0_119 = arith.constant 0 : index
    %188 = arith.index_cast %187 : i32 to index
    %c0_120 = arith.constant 0 : index
    %c0_121 = arith.constant 0 : index
    %189 = vector.load %arg2[%c0_119, %188, %c0_120, %c0_121] : memref<1x42x8x130xbf16, #tpu.memory_space<vmem>>, vector<1x1x8x130xbf16>
    %190 = vector.shape_cast %189 : vector<1x1x8x130xbf16> to vector<8x130xbf16>
    %191 = vector.extract_strided_slice %190 {offsets = [0, 0], sizes = [8, 128], strides = [1, 1]} : vector<8x130xbf16> to vector<8x128xbf16>
    %cst_122 = arith.constant dense<0.000000e+00> : vector<16x128xf32>
    %192 = tpu.matmul %14, %191, %cst_122 {dimension_numbers = #tpu.dot_dimension_numbers<[1], [0], [0], [1], [0, 0, 1, 1], [], []>} : vector<16x8xbf16>, vector<8x128xbf16>, vector<16x128xf32> -> vector<16x128xf32>
    %193 = arith.addf %185, %192 : vector<16x128xf32>
    %194 = vector.extract_strided_slice %190 {offsets = [0, 1], sizes = [8, 128], strides = [1, 1]} : vector<8x130xbf16> to vector<8x128xbf16>
    %cst_123 = arith.constant dense<0.000000e+00> : vector<16x128xf32>
    %195 = tpu.matmul %16, %194, %cst_123 {dimension_numbers = #tpu.dot_dimension_numbers<[1], [0], [0], [1], [0, 0, 1, 1], [], []>} : vector<16x8xbf16>, vector<8x128xbf16>, vector<16x128xf32> -> vector<16x128xf32>
    %196 = arith.addf %193, %195 : vector<16x128xf32>
    %197 = vector.extract_strided_slice %190 {offsets = [0, 2], sizes = [8, 128], strides = [1, 1]} : vector<8x130xbf16> to vector<8x128xbf16>
    %cst_124 = arith.constant dense<0.000000e+00> : vector<16x128xf32>
    %198 = tpu.matmul %18, %197, %cst_124 {dimension_numbers = #tpu.dot_dimension_numbers<[1], [0], [0], [1], [0, 0, 1, 1], [], []>} : vector<16x8xbf16>, vector<8x128xbf16>, vector<16x128xf32> -> vector<16x128xf32>
    %199 = arith.addf %196, %198 : vector<16x128xf32>
    %c0_125 = arith.constant 0 : index
    %c3_126 = arith.constant 3 : index
    %c0_127 = arith.constant 0 : index
    %c0_128 = arith.constant 0 : index
    %200 = vector.load %arg4[%c0_125, %c3_126, %c0_127, %c0_128] : memref<1x8x16x128xf32, #tpu.memory_space<vmem>>, vector<1x1x16x128xf32>
    %201 = vector.shape_cast %200 : vector<1x1x16x128xf32> to vector<16x128xf32>
    %202 = vector.shape_cast %199 : vector<16x128xf32> to vector<1x1x16x128xf32>
    tpu.vector_store %arg4[%c0_125, %c3_126, %c0_127, %c0_128], %202 {strides = array<i32>} : memref<1x8x16x128xf32, #tpu.memory_space<vmem>>, vector<1x1x16x128xf32>,
    %cst_129 = arith.constant 0.000000e+00 : f32
    %203 = vector.broadcast %cst_129 : f32 to vector<16x128xf32>
    %c4_i32 = arith.constant 4 : i32
    %204 = arith.addi %0, %c4_i32 : i32
    %c0_i32_130 = arith.constant 0 : i32
    %205 = arith.addi %204, %c0_i32_130 : i32
    %c0_131 = arith.constant 0 : index
    %206 = arith.index_cast %205 : i32 to index
    %c0_132 = arith.constant 0 : index
    %c0_133 = arith.constant 0 : index
    %207 = vector.load %arg2[%c0_131, %206, %c0_132, %c0_133] : memref<1x42x8x130xbf16, #tpu.memory_space<vmem>>, vector<1x1x8x130xbf16>
    %208 = vector.shape_cast %207 : vector<1x1x8x130xbf16> to vector<8x130xbf16>
    %209 = vector.extract_strided_slice %208 {offsets = [0, 0], sizes = [8, 128], strides = [1, 1]} : vector<8x130xbf16> to vector<8x128xbf16>
    %cst_134 = arith.constant dense<0.000000e+00> : vector<16x128xf32>
    %210 = tpu.matmul %2, %209, %cst_134 {dimension_numbers = #tpu.dot_dimension_numbers<[1], [0], [0], [1], [0, 0, 1, 1], [], []>} : vector<16x8xbf16>, vector<8x128xbf16>, vector<16x128xf32> -> vector<16x128xf32>
    %211 = arith.addf %203, %210 : vector<16x128xf32>
    %212 = vector.extract_strided_slice %208 {offsets = [0, 1], sizes = [8, 128], strides = [1, 1]} : vector<8x130xbf16> to vector<8x128xbf16>
    %cst_135 = arith.constant dense<0.000000e+00> : vector<16x128xf32>
    %213 = tpu.matmul %4, %212, %cst_135 {dimension_numbers = #tpu.dot_dimension_numbers<[1], [0], [0], [1], [0, 0, 1, 1], [], []>} : vector<16x8xbf16>, vector<8x128xbf16>, vector<16x128xf32> -> vector<16x128xf32>
    %214 = arith.addf %211, %213 : vector<16x128xf32>
    %215 = vector.extract_strided_slice %208 {offsets = [0, 2], sizes = [8, 128], strides = [1, 1]} : vector<8x130xbf16> to vector<8x128xbf16>
    %cst_136 = arith.constant dense<0.000000e+00> : vector<16x128xf32>
    %216 = tpu.matmul %6, %215, %cst_136 {dimension_numbers = #tpu.dot_dimension_numbers<[1], [0], [0], [1], [0, 0, 1, 1], [], []>} : vector<16x8xbf16>, vector<8x128xbf16>, vector<16x128xf32> -> vector<16x128xf32>
    %217 = arith.addf %214, %216 : vector<16x128xf32>
    %c4_i32_137 = arith.constant 4 : i32
    %218 = arith.addi %0, %c4_i32_137 : i32
    %c1_i32_138 = arith.constant 1 : i32
    %219 = arith.addi %218, %c1_i32_138 : i32
    %c0_139 = arith.constant 0 : index
    %220 = arith.index_cast %219 : i32 to index
    %c0_140 = arith.constant 0 : index
    %c0_141 = arith.constant 0 : index
    %221 = vector.load %arg2[%c0_139, %220, %c0_140, %c0_141] : memref<1x42x8x130xbf16, #tpu.memory_space<vmem>>, vector<1x1x8x130xbf16>
    %222 = vector.shape_cast %221 : vector<1x1x8x130xbf16> to vector<8x130xbf16>
    %223 = vector.extract_strided_slice %222 {offsets = [0, 0], sizes = [8, 128], strides = [1, 1]} : vector<8x130xbf16> to vector<8x128xbf16>
    %cst_142 = arith.constant dense<0.000000e+00> : vector<16x128xf32>
    %224 = tpu.matmul %8, %223, %cst_142 {dimension_numbers = #tpu.dot_dimension_numbers<[1], [0], [0], [1], [0, 0, 1, 1], [], []>} : vector<16x8xbf16>, vector<8x128xbf16>, vector<16x128xf32> -> vector<16x128xf32>
    %225 = arith.addf %217, %224 : vector<16x128xf32>
    %226 = vector.extract_strided_slice %222 {offsets = [0, 1], sizes = [8, 128], strides = [1, 1]} : vector<8x130xbf16> to vector<8x128xbf16>
    %cst_143 = arith.constant dense<0.000000e+00> : vector<16x128xf32>
    %227 = tpu.matmul %10, %226, %cst_143 {dimension_numbers = #tpu.dot_dimension_numbers<[1], [0], [0], [1], [0, 0, 1, 1], [], []>} : vector<16x8xbf16>, vector<8x128xbf16>, vector<16x128xf32> -> vector<16x128xf32>
    %228 = arith.addf %225, %227 : vector<16x128xf32>
    %229 = vector.extract_strided_slice %222 {offsets = [0, 2], sizes = [8, 128], strides = [1, 1]} : vector<8x130xbf16> to vector<8x128xbf16>
    %cst_144 = arith.constant dense<0.000000e+00> : vector<16x128xf32>
    %230 = tpu.matmul %12, %229, %cst_144 {dimension_numbers = #tpu.dot_dimension_numbers<[1], [0], [0], [1], [0, 0, 1, 1], [], []>} : vector<16x8xbf16>, vector<8x128xbf16>, vector<16x128xf32> -> vector<16x128xf32>
    %231 = arith.addf %228, %230 : vector<16x128xf32>
    %c4_i32_145 = arith.constant 4 : i32
    %232 = arith.addi %0, %c4_i32_145 : i32
    %c2_i32_146 = arith.constant 2 : i32
    %233 = arith.addi %232, %c2_i32_146 : i32
    %c0_147 = arith.constant 0 : index
    %234 = arith.index_cast %233 : i32 to index
    %c0_148 = arith.constant 0 : index
    %c0_149 = arith.constant 0 : index
    %235 = vector.load %arg2[%c0_147, %234, %c0_148, %c0_149] : memref<1x42x8x130xbf16, #tpu.memory_space<vmem>>, vector<1x1x8x130xbf16>
    %236 = vector.shape_cast %235 : vector<1x1x8x130xbf16> to vector<8x130xbf16>
    %237 = vector.extract_strided_slice %236 {offsets = [0, 0], sizes = [8, 128], strides = [1, 1]} : vector<8x130xbf16> to vector<8x128xbf16>
    %cst_150 = arith.constant dense<0.000000e+00> : vector<16x128xf32>
    %238 = tpu.matmul %14, %237, %cst_150 {dimension_numbers = #tpu.dot_dimension_numbers<[1], [0], [0], [1], [0, 0, 1, 1], [], []>} : vector<16x8xbf16>, vector<8x128xbf16>, vector<16x128xf32> -> vector<16x128xf32>
    %239 = arith.addf %231, %238 : vector<16x128xf32>
    %240 = vector.extract_strided_slice %236 {offsets = [0, 1], sizes = [8, 128], strides = [1, 1]} : vector<8x130xbf16> to vector<8x128xbf16>
    %cst_151 = arith.constant dense<0.000000e+00> : vector<16x128xf32>
    %241 = tpu.matmul %16, %240, %cst_151 {dimension_numbers = #tpu.dot_dimension_numbers<[1], [0], [0], [1], [0, 0, 1, 1], [], []>} : vector<16x8xbf16>, vector<8x128xbf16>, vector<16x128xf32> -> vector<16x128xf32>
    %242 = arith.addf %239, %241 : vector<16x128xf32>
    %243 = vector.extract_strided_slice %236 {offsets = [0, 2], sizes = [8, 128], strides = [1, 1]} : vector<8x130xbf16> to vector<8x128xbf16>
    %cst_152 = arith.constant dense<0.000000e+00> : vector<16x128xf32>
    %244 = tpu.matmul %18, %243, %cst_152 {dimension_numbers = #tpu.dot_dimension_numbers<[1], [0], [0], [1], [0, 0, 1, 1], [], []>} : vector<16x8xbf16>, vector<8x128xbf16>, vector<16x128xf32> -> vector<16x128xf32>
    %245 = arith.addf %242, %244 : vector<16x128xf32>
    %c0_153 = arith.constant 0 : index
    %c4_154 = arith.constant 4 : index
    %c0_155 = arith.constant 0 : index
    %c0_156 = arith.constant 0 : index
    %246 = vector.load %arg4[%c0_153, %c4_154, %c0_155, %c0_156] : memref<1x8x16x128xf32, #tpu.memory_space<vmem>>, vector<1x1x16x128xf32>
    %247 = vector.shape_cast %246 : vector<1x1x16x128xf32> to vector<16x128xf32>
    %248 = vector.shape_cast %245 : vector<16x128xf32> to vector<1x1x16x128xf32>
    tpu.vector_store %arg4[%c0_153, %c4_154, %c0_155, %c0_156], %248 {strides = array<i32>} : memref<1x8x16x128xf32, #tpu.memory_space<vmem>>, vector<1x1x16x128xf32>,
    %cst_157 = arith.constant 0.000000e+00 : f32
    %249 = vector.broadcast %cst_157 : f32 to vector<16x128xf32>
    %c5_i32 = arith.constant 5 : i32
    %250 = arith.addi %0, %c5_i32 : i32
    %c0_i32_158 = arith.constant 0 : i32
    %251 = arith.addi %250, %c0_i32_158 : i32
    %c0_159 = arith.constant 0 : index
    %252 = arith.index_cast %251 : i32 to index
    %c0_160 = arith.constant 0 : index
    %c0_161 = arith.constant 0 : index
    %253 = vector.load %arg2[%c0_159, %252, %c0_160, %c0_161] : memref<1x42x8x130xbf16, #tpu.memory_space<vmem>>, vector<1x1x8x130xbf16>
    %254 = vector.shape_cast %253 : vector<1x1x8x130xbf16> to vector<8x130xbf16>
    %255 = vector.extract_strided_slice %254 {offsets = [0, 0], sizes = [8, 128], strides = [1, 1]} : vector<8x130xbf16> to vector<8x128xbf16>
    %cst_162 = arith.constant dense<0.000000e+00> : vector<16x128xf32>
    %256 = tpu.matmul %2, %255, %cst_162 {dimension_numbers = #tpu.dot_dimension_numbers<[1], [0], [0], [1], [0, 0, 1, 1], [], []>} : vector<16x8xbf16>, vector<8x128xbf16>, vector<16x128xf32> -> vector<16x128xf32>
    %257 = arith.addf %249, %256 : vector<16x128xf32>
    %258 = vector.extract_strided_slice %254 {offsets = [0, 1], sizes = [8, 128], strides = [1, 1]} : vector<8x130xbf16> to vector<8x128xbf16>
    %cst_163 = arith.constant dense<0.000000e+00> : vector<16x128xf32>
    %259 = tpu.matmul %4, %258, %cst_163 {dimension_numbers = #tpu.dot_dimension_numbers<[1], [0], [0], [1], [0, 0, 1, 1], [], []>} : vector<16x8xbf16>, vector<8x128xbf16>, vector<16x128xf32> -> vector<16x128xf32>
    %260 = arith.addf %257, %259 : vector<16x128xf32>
    %261 = vector.extract_strided_slice %254 {offsets = [0, 2], sizes = [8, 128], strides = [1, 1]} : vector<8x130xbf16> to vector<8x128xbf16>
    %cst_164 = arith.constant dense<0.000000e+00> : vector<16x128xf32>
    %262 = tpu.matmul %6, %261, %cst_164 {dimension_numbers = #tpu.dot_dimension_numbers<[1], [0], [0], [1], [0, 0, 1, 1], [], []>} : vector<16x8xbf16>, vector<8x128xbf16>, vector<16x128xf32> -> vector<16x128xf32>
    %263 = arith.addf %260, %262 : vector<16x128xf32>
    %c5_i32_165 = arith.constant 5 : i32
    %264 = arith.addi %0, %c5_i32_165 : i32
    %c1_i32_166 = arith.constant 1 : i32
    %265 = arith.addi %264, %c1_i32_166 : i32
    %c0_167 = arith.constant 0 : index
    %266 = arith.index_cast %265 : i32 to index
    %c0_168 = arith.constant 0 : index
    %c0_169 = arith.constant 0 : index
    %267 = vector.load %arg2[%c0_167, %266, %c0_168, %c0_169] : memref<1x42x8x130xbf16, #tpu.memory_space<vmem>>, vector<1x1x8x130xbf16>
    %268 = vector.shape_cast %267 : vector<1x1x8x130xbf16> to vector<8x130xbf16>
    %269 = vector.extract_strided_slice %268 {offsets = [0, 0], sizes = [8, 128], strides = [1, 1]} : vector<8x130xbf16> to vector<8x128xbf16>
    %cst_170 = arith.constant dense<0.000000e+00> : vector<16x128xf32>
    %270 = tpu.matmul %8, %269, %cst_170 {dimension_numbers = #tpu.dot_dimension_numbers<[1], [0], [0], [1], [0, 0, 1, 1], [], []>} : vector<16x8xbf16>, vector<8x128xbf16>, vector<16x128xf32> -> vector<16x128xf32>
    %271 = arith.addf %263, %270 : vector<16x128xf32>
    %272 = vector.extract_strided_slice %268 {offsets = [0, 1], sizes = [8, 128], strides = [1, 1]} : vector<8x130xbf16> to vector<8x128xbf16>
    %cst_171 = arith.constant dense<0.000000e+00> : vector<16x128xf32>
    %273 = tpu.matmul %10, %272, %cst_171 {dimension_numbers = #tpu.dot_dimension_numbers<[1], [0], [0], [1], [0, 0, 1, 1], [], []>} : vector<16x8xbf16>, vector<8x128xbf16>, vector<16x128xf32> -> vector<16x128xf32>
    %274 = arith.addf %271, %273 : vector<16x128xf32>
    %275 = vector.extract_strided_slice %268 {offsets = [0, 2], sizes = [8, 128], strides = [1, 1]} : vector<8x130xbf16> to vector<8x128xbf16>
    %cst_172 = arith.constant dense<0.000000e+00> : vector<16x128xf32>
    %276 = tpu.matmul %12, %275, %cst_172 {dimension_numbers = #tpu.dot_dimension_numbers<[1], [0], [0], [1], [0, 0, 1, 1], [], []>} : vector<16x8xbf16>, vector<8x128xbf16>, vector<16x128xf32> -> vector<16x128xf32>
    %277 = arith.addf %274, %276 : vector<16x128xf32>
    %c5_i32_173 = arith.constant 5 : i32
    %278 = arith.addi %0, %c5_i32_173 : i32
    %c2_i32_174 = arith.constant 2 : i32
    %279 = arith.addi %278, %c2_i32_174 : i32
    %c0_175 = arith.constant 0 : index
    %280 = arith.index_cast %279 : i32 to index
    %c0_176 = arith.constant 0 : index
    %c0_177 = arith.constant 0 : index
    %281 = vector.load %arg2[%c0_175, %280, %c0_176, %c0_177] : memref<1x42x8x130xbf16, #tpu.memory_space<vmem>>, vector<1x1x8x130xbf16>
    %282 = vector.shape_cast %281 : vector<1x1x8x130xbf16> to vector<8x130xbf16>
    %283 = vector.extract_strided_slice %282 {offsets = [0, 0], sizes = [8, 128], strides = [1, 1]} : vector<8x130xbf16> to vector<8x128xbf16>
    %cst_178 = arith.constant dense<0.000000e+00> : vector<16x128xf32>
    %284 = tpu.matmul %14, %283, %cst_178 {dimension_numbers = #tpu.dot_dimension_numbers<[1], [0], [0], [1], [0, 0, 1, 1], [], []>} : vector<16x8xbf16>, vector<8x128xbf16>, vector<16x128xf32> -> vector<16x128xf32>
    %285 = arith.addf %277, %284 : vector<16x128xf32>
    %286 = vector.extract_strided_slice %282 {offsets = [0, 1], sizes = [8, 128], strides = [1, 1]} : vector<8x130xbf16> to vector<8x128xbf16>
    %cst_179 = arith.constant dense<0.000000e+00> : vector<16x128xf32>
    %287 = tpu.matmul %16, %286, %cst_179 {dimension_numbers = #tpu.dot_dimension_numbers<[1], [0], [0], [1], [0, 0, 1, 1], [], []>} : vector<16x8xbf16>, vector<8x128xbf16>, vector<16x128xf32> -> vector<16x128xf32>
    %288 = arith.addf %285, %287 : vector<16x128xf32>
    %289 = vector.extract_strided_slice %282 {offsets = [0, 2], sizes = [8, 128], strides = [1, 1]} : vector<8x130xbf16> to vector<8x128xbf16>
    %cst_180 = arith.constant dense<0.000000e+00> : vector<16x128xf32>
    %290 = tpu.matmul %18, %289, %cst_180 {dimension_numbers = #tpu.dot_dimension_numbers<[1], [0], [0], [1], [0, 0, 1, 1], [], []>} : vector<16x8xbf16>, vector<8x128xbf16>, vector<16x128xf32> -> vector<16x128xf32>
    %291 = arith.addf %288, %290 : vector<16x128xf32>
    %c0_181 = arith.constant 0 : index
    %c5_182 = arith.constant 5 : index
    %c0_183 = arith.constant 0 : index
    %c0_184 = arith.constant 0 : index
    %292 = vector.load %arg4[%c0_181, %c5_182, %c0_183, %c0_184] : memref<1x8x16x128xf32, #tpu.memory_space<vmem>>, vector<1x1x16x128xf32>
    %293 = vector.shape_cast %292 : vector<1x1x16x128xf32> to vector<16x128xf32>
    %294 = vector.shape_cast %291 : vector<16x128xf32> to vector<1x1x16x128xf32>
    tpu.vector_store %arg4[%c0_181, %c5_182, %c0_183, %c0_184], %294 {strides = array<i32>} : memref<1x8x16x128xf32, #tpu.memory_space<vmem>>, vector<1x1x16x128xf32>,
    %cst_185 = arith.constant 0.000000e+00 : f32
    %295 = vector.broadcast %cst_185 : f32 to vector<16x128xf32>
    %c6_i32 = arith.constant 6 : i32
    %296 = arith.addi %0, %c6_i32 : i32
    %c0_i32_186 = arith.constant 0 : i32
    %297 = arith.addi %296, %c0_i32_186 : i32
    %c0_187 = arith.constant 0 : index
    %298 = arith.index_cast %297 : i32 to index
    %c0_188 = arith.constant 0 : index
    %c0_189 = arith.constant 0 : index
    %299 = vector.load %arg2[%c0_187, %298, %c0_188, %c0_189] : memref<1x42x8x130xbf16, #tpu.memory_space<vmem>>, vector<1x1x8x130xbf16>
    %300 = vector.shape_cast %299 : vector<1x1x8x130xbf16> to vector<8x130xbf16>
    %301 = vector.extract_strided_slice %300 {offsets = [0, 0], sizes = [8, 128], strides = [1, 1]} : vector<8x130xbf16> to vector<8x128xbf16>
    %cst_190 = arith.constant dense<0.000000e+00> : vector<16x128xf32>
    %302 = tpu.matmul %2, %301, %cst_190 {dimension_numbers = #tpu.dot_dimension_numbers<[1], [0], [0], [1], [0, 0, 1, 1], [], []>} : vector<16x8xbf16>, vector<8x128xbf16>, vector<16x128xf32> -> vector<16x128xf32>
    %303 = arith.addf %295, %302 : vector<16x128xf32>
    %304 = vector.extract_strided_slice %300 {offsets = [0, 1], sizes = [8, 128], strides = [1, 1]} : vector<8x130xbf16> to vector<8x128xbf16>
    %cst_191 = arith.constant dense<0.000000e+00> : vector<16x128xf32>
    %305 = tpu.matmul %4, %304, %cst_191 {dimension_numbers = #tpu.dot_dimension_numbers<[1], [0], [0], [1], [0, 0, 1, 1], [], []>} : vector<16x8xbf16>, vector<8x128xbf16>, vector<16x128xf32> -> vector<16x128xf32>
    %306 = arith.addf %303, %305 : vector<16x128xf32>
    %307 = vector.extract_strided_slice %300 {offsets = [0, 2], sizes = [8, 128], strides = [1, 1]} : vector<8x130xbf16> to vector<8x128xbf16>
    %cst_192 = arith.constant dense<0.000000e+00> : vector<16x128xf32>
    %308 = tpu.matmul %6, %307, %cst_192 {dimension_numbers = #tpu.dot_dimension_numbers<[1], [0], [0], [1], [0, 0, 1, 1], [], []>} : vector<16x8xbf16>, vector<8x128xbf16>, vector<16x128xf32> -> vector<16x128xf32>
    %309 = arith.addf %306, %308 : vector<16x128xf32>
    %c6_i32_193 = arith.constant 6 : i32
    %310 = arith.addi %0, %c6_i32_193 : i32
    %c1_i32_194 = arith.constant 1 : i32
    %311 = arith.addi %310, %c1_i32_194 : i32
    %c0_195 = arith.constant 0 : index
    %312 = arith.index_cast %311 : i32 to index
    %c0_196 = arith.constant 0 : index
    %c0_197 = arith.constant 0 : index
    %313 = vector.load %arg2[%c0_195, %312, %c0_196, %c0_197] : memref<1x42x8x130xbf16, #tpu.memory_space<vmem>>, vector<1x1x8x130xbf16>
    %314 = vector.shape_cast %313 : vector<1x1x8x130xbf16> to vector<8x130xbf16>
    %315 = vector.extract_strided_slice %314 {offsets = [0, 0], sizes = [8, 128], strides = [1, 1]} : vector<8x130xbf16> to vector<8x128xbf16>
    %cst_198 = arith.constant dense<0.000000e+00> : vector<16x128xf32>
    %316 = tpu.matmul %8, %315, %cst_198 {dimension_numbers = #tpu.dot_dimension_numbers<[1], [0], [0], [1], [0, 0, 1, 1], [], []>} : vector<16x8xbf16>, vector<8x128xbf16>, vector<16x128xf32> -> vector<16x128xf32>
    %317 = arith.addf %309, %316 : vector<16x128xf32>
    %318 = vector.extract_strided_slice %314 {offsets = [0, 1], sizes = [8, 128], strides = [1, 1]} : vector<8x130xbf16> to vector<8x128xbf16>
    %cst_199 = arith.constant dense<0.000000e+00> : vector<16x128xf32>
    %319 = tpu.matmul %10, %318, %cst_199 {dimension_numbers = #tpu.dot_dimension_numbers<[1], [0], [0], [1], [0, 0, 1, 1], [], []>} : vector<16x8xbf16>, vector<8x128xbf16>, vector<16x128xf32> -> vector<16x128xf32>
    %320 = arith.addf %317, %319 : vector<16x128xf32>
    %321 = vector.extract_strided_slice %314 {offsets = [0, 2], sizes = [8, 128], strides = [1, 1]} : vector<8x130xbf16> to vector<8x128xbf16>
    %cst_200 = arith.constant dense<0.000000e+00> : vector<16x128xf32>
    %322 = tpu.matmul %12, %321, %cst_200 {dimension_numbers = #tpu.dot_dimension_numbers<[1], [0], [0], [1], [0, 0, 1, 1], [], []>} : vector<16x8xbf16>, vector<8x128xbf16>, vector<16x128xf32> -> vector<16x128xf32>
    %323 = arith.addf %320, %322 : vector<16x128xf32>
    %c6_i32_201 = arith.constant 6 : i32
    %324 = arith.addi %0, %c6_i32_201 : i32
    %c2_i32_202 = arith.constant 2 : i32
    %325 = arith.addi %324, %c2_i32_202 : i32
    %c0_203 = arith.constant 0 : index
    %326 = arith.index_cast %325 : i32 to index
    %c0_204 = arith.constant 0 : index
    %c0_205 = arith.constant 0 : index
    %327 = vector.load %arg2[%c0_203, %326, %c0_204, %c0_205] : memref<1x42x8x130xbf16, #tpu.memory_space<vmem>>, vector<1x1x8x130xbf16>
    %328 = vector.shape_cast %327 : vector<1x1x8x130xbf16> to vector<8x130xbf16>
    %329 = vector.extract_strided_slice %328 {offsets = [0, 0], sizes = [8, 128], strides = [1, 1]} : vector<8x130xbf16> to vector<8x128xbf16>
    %cst_206 = arith.constant dense<0.000000e+00> : vector<16x128xf32>
    %330 = tpu.matmul %14, %329, %cst_206 {dimension_numbers = #tpu.dot_dimension_numbers<[1], [0], [0], [1], [0, 0, 1, 1], [], []>} : vector<16x8xbf16>, vector<8x128xbf16>, vector<16x128xf32> -> vector<16x128xf32>
    %331 = arith.addf %323, %330 : vector<16x128xf32>
    %332 = vector.extract_strided_slice %328 {offsets = [0, 1], sizes = [8, 128], strides = [1, 1]} : vector<8x130xbf16> to vector<8x128xbf16>
    %cst_207 = arith.constant dense<0.000000e+00> : vector<16x128xf32>
    %333 = tpu.matmul %16, %332, %cst_207 {dimension_numbers = #tpu.dot_dimension_numbers<[1], [0], [0], [1], [0, 0, 1, 1], [], []>} : vector<16x8xbf16>, vector<8x128xbf16>, vector<16x128xf32> -> vector<16x128xf32>
    %334 = arith.addf %331, %333 : vector<16x128xf32>
    %335 = vector.extract_strided_slice %328 {offsets = [0, 2], sizes = [8, 128], strides = [1, 1]} : vector<8x130xbf16> to vector<8x128xbf16>
    %cst_208 = arith.constant dense<0.000000e+00> : vector<16x128xf32>
    %336 = tpu.matmul %18, %335, %cst_208 {dimension_numbers = #tpu.dot_dimension_numbers<[1], [0], [0], [1], [0, 0, 1, 1], [], []>} : vector<16x8xbf16>, vector<8x128xbf16>, vector<16x128xf32> -> vector<16x128xf32>
    %337 = arith.addf %334, %336 : vector<16x128xf32>
    %c0_209 = arith.constant 0 : index
    %c6_210 = arith.constant 6 : index
    %c0_211 = arith.constant 0 : index
    %c0_212 = arith.constant 0 : index
    %338 = vector.load %arg4[%c0_209, %c6_210, %c0_211, %c0_212] : memref<1x8x16x128xf32, #tpu.memory_space<vmem>>, vector<1x1x16x128xf32>
    %339 = vector.shape_cast %338 : vector<1x1x16x128xf32> to vector<16x128xf32>
    %340 = vector.shape_cast %337 : vector<16x128xf32> to vector<1x1x16x128xf32>
    tpu.vector_store %arg4[%c0_209, %c6_210, %c0_211, %c0_212], %340 {strides = array<i32>} : memref<1x8x16x128xf32, #tpu.memory_space<vmem>>, vector<1x1x16x128xf32>,
    %cst_213 = arith.constant 0.000000e+00 : f32
    %341 = vector.broadcast %cst_213 : f32 to vector<16x128xf32>
    %c7_i32 = arith.constant 7 : i32
    %342 = arith.addi %0, %c7_i32 : i32
    %c0_i32_214 = arith.constant 0 : i32
    %343 = arith.addi %342, %c0_i32_214 : i32
    %c0_215 = arith.constant 0 : index
    %344 = arith.index_cast %343 : i32 to index
    %c0_216 = arith.constant 0 : index
    %c0_217 = arith.constant 0 : index
    %345 = vector.load %arg2[%c0_215, %344, %c0_216, %c0_217] : memref<1x42x8x130xbf16, #tpu.memory_space<vmem>>, vector<1x1x8x130xbf16>
    %346 = vector.shape_cast %345 : vector<1x1x8x130xbf16> to vector<8x130xbf16>
    %347 = vector.extract_strided_slice %346 {offsets = [0, 0], sizes = [8, 128], strides = [1, 1]} : vector<8x130xbf16> to vector<8x128xbf16>
    %cst_218 = arith.constant dense<0.000000e+00> : vector<16x128xf32>
    %348 = tpu.matmul %2, %347, %cst_218 {dimension_numbers = #tpu.dot_dimension_numbers<[1], [0], [0], [1], [0, 0, 1, 1], [], []>} : vector<16x8xbf16>, vector<8x128xbf16>, vector<16x128xf32> -> vector<16x128xf32>
    %349 = arith.addf %341, %348 : vector<16x128xf32>
    %350 = vector.extract_strided_slice %346 {offsets = [0, 1], sizes = [8, 128], strides = [1, 1]} : vector<8x130xbf16> to vector<8x128xbf16>
    %cst_219 = arith.constant dense<0.000000e+00> : vector<16x128xf32>
    %351 = tpu.matmul %4, %350, %cst_219 {dimension_numbers = #tpu.dot_dimension_numbers<[1], [0], [0], [1], [0, 0, 1, 1], [], []>} : vector<16x8xbf16>, vector<8x128xbf16>, vector<16x128xf32> -> vector<16x128xf32>
    %352 = arith.addf %349, %351 : vector<16x128xf32>
    %353 = vector.extract_strided_slice %346 {offsets = [0, 2], sizes = [8, 128], strides = [1, 1]} : vector<8x130xbf16> to vector<8x128xbf16>
    %cst_220 = arith.constant dense<0.000000e+00> : vector<16x128xf32>
    %354 = tpu.matmul %6, %353, %cst_220 {dimension_numbers = #tpu.dot_dimension_numbers<[1], [0], [0], [1], [0, 0, 1, 1], [], []>} : vector<16x8xbf16>, vector<8x128xbf16>, vector<16x128xf32> -> vector<16x128xf32>
    %355 = arith.addf %352, %354 : vector<16x128xf32>
    %c7_i32_221 = arith.constant 7 : i32
    %356 = arith.addi %0, %c7_i32_221 : i32
    %c1_i32_222 = arith.constant 1 : i32
    %357 = arith.addi %356, %c1_i32_222 : i32
    %c0_223 = arith.constant 0 : index
    %358 = arith.index_cast %357 : i32 to index
    %c0_224 = arith.constant 0 : index
    %c0_225 = arith.constant 0 : index
    %359 = vector.load %arg2[%c0_223, %358, %c0_224, %c0_225] : memref<1x42x8x130xbf16, #tpu.memory_space<vmem>>, vector<1x1x8x130xbf16>
    %360 = vector.shape_cast %359 : vector<1x1x8x130xbf16> to vector<8x130xbf16>
    %361 = vector.extract_strided_slice %360 {offsets = [0, 0], sizes = [8, 128], strides = [1, 1]} : vector<8x130xbf16> to vector<8x128xbf16>
    %cst_226 = arith.constant dense<0.000000e+00> : vector<16x128xf32>
    %362 = tpu.matmul %8, %361, %cst_226 {dimension_numbers = #tpu.dot_dimension_numbers<[1], [0], [0], [1], [0, 0, 1, 1], [], []>} : vector<16x8xbf16>, vector<8x128xbf16>, vector<16x128xf32> -> vector<16x128xf32>
    %363 = arith.addf %355, %362 : vector<16x128xf32>
    %364 = vector.extract_strided_slice %360 {offsets = [0, 1], sizes = [8, 128], strides = [1, 1]} : vector<8x130xbf16> to vector<8x128xbf16>
    %cst_227 = arith.constant dense<0.000000e+00> : vector<16x128xf32>
    %365 = tpu.matmul %10, %364, %cst_227 {dimension_numbers = #tpu.dot_dimension_numbers<[1], [0], [0], [1], [0, 0, 1, 1], [], []>} : vector<16x8xbf16>, vector<8x128xbf16>, vector<16x128xf32> -> vector<16x128xf32>
    %366 = arith.addf %363, %365 : vector<16x128xf32>
    %367 = vector.extract_strided_slice %360 {offsets = [0, 2], sizes = [8, 128], strides = [1, 1]} : vector<8x130xbf16> to vector<8x128xbf16>
    %cst_228 = arith.constant dense<0.000000e+00> : vector<16x128xf32>
    %368 = tpu.matmul %12, %367, %cst_228 {dimension_numbers = #tpu.dot_dimension_numbers<[1], [0], [0], [1], [0, 0, 1, 1], [], []>} : vector<16x8xbf16>, vector<8x128xbf16>, vector<16x128xf32> -> vector<16x128xf32>
    %369 = arith.addf %366, %368 : vector<16x128xf32>
    %c7_i32_229 = arith.constant 7 : i32
    %370 = arith.addi %0, %c7_i32_229 : i32
    %c2_i32_230 = arith.constant 2 : i32
    %371 = arith.addi %370, %c2_i32_230 : i32
    %c0_231 = arith.constant 0 : index
    %372 = arith.index_cast %371 : i32 to index
    %c0_232 = arith.constant 0 : index
    %c0_233 = arith.constant 0 : index
    %373 = vector.load %arg2[%c0_231, %372, %c0_232, %c0_233] : memref<1x42x8x130xbf16, #tpu.memory_space<vmem>>, vector<1x1x8x130xbf16>
    %374 = vector.shape_cast %373 : vector<1x1x8x130xbf16> to vector<8x130xbf16>
    %375 = vector.extract_strided_slice %374 {offsets = [0, 0], sizes = [8, 128], strides = [1, 1]} : vector<8x130xbf16> to vector<8x128xbf16>
    %cst_234 = arith.constant dense<0.000000e+00> : vector<16x128xf32>
    %376 = tpu.matmul %14, %375, %cst_234 {dimension_numbers = #tpu.dot_dimension_numbers<[1], [0], [0], [1], [0, 0, 1, 1], [], []>} : vector<16x8xbf16>, vector<8x128xbf16>, vector<16x128xf32> -> vector<16x128xf32>
    %377 = arith.addf %369, %376 : vector<16x128xf32>
    %378 = vector.extract_strided_slice %374 {offsets = [0, 1], sizes = [8, 128], strides = [1, 1]} : vector<8x130xbf16> to vector<8x128xbf16>
    %cst_235 = arith.constant dense<0.000000e+00> : vector<16x128xf32>
    %379 = tpu.matmul %16, %378, %cst_235 {dimension_numbers = #tpu.dot_dimension_numbers<[1], [0], [0], [1], [0, 0, 1, 1], [], []>} : vector<16x8xbf16>, vector<8x128xbf16>, vector<16x128xf32> -> vector<16x128xf32>
    %380 = arith.addf %377, %379 : vector<16x128xf32>
    %381 = vector.extract_strided_slice %374 {offsets = [0, 2], sizes = [8, 128], strides = [1, 1]} : vector<8x130xbf16> to vector<8x128xbf16>
    %cst_236 = arith.constant dense<0.000000e+00> : vector<16x128xf32>
    %382 = tpu.matmul %18, %381, %cst_236 {dimension_numbers = #tpu.dot_dimension_numbers<[1], [0], [0], [1], [0, 0, 1, 1], [], []>} : vector<16x8xbf16>, vector<8x128xbf16>, vector<16x128xf32> -> vector<16x128xf32>
    %383 = arith.addf %380, %382 : vector<16x128xf32>
    %c0_237 = arith.constant 0 : index
    %c7_238 = arith.constant 7 : index
    %c0_239 = arith.constant 0 : index
    %c0_240 = arith.constant 0 : index
    %384 = vector.load %arg4[%c0_237, %c7_238, %c0_239, %c0_240] : memref<1x8x16x128xf32, #tpu.memory_space<vmem>>, vector<1x1x16x128xf32>
    %385 = vector.shape_cast %384 : vector<1x1x16x128xf32> to vector<16x128xf32>
    %386 = vector.shape_cast %383 : vector<16x128xf32> to vector<1x1x16x128xf32>
    tpu.vector_store %arg4[%c0_237, %c7_238, %c0_239, %c0_240], %386 {strides = array<i32>} : memref<1x8x16x128xf32, #tpu.memory_space<vmem>>, vector<1x1x16x128xf32>,
    return
  }
  func.func @transform_0(%arg0: i32, %arg1: i32) -> (i32, i32, i32, i32) {
    %c0_i32 = arith.constant 0 : i32
    %c0_i32_0 = arith.constant 0 : i32
    %c0_i32_1 = arith.constant 0 : i32
    %c0_i32_2 = arith.constant 0 : i32
    return %arg0, %c0_i32, %c0_i32_0, %c0_i32_1 : i32, i32, i32, i32
  }
  func.func @transform_1(%arg0: i32, %arg1: i32) -> (i32, i32, i32) {
    %c0_i32 = arith.constant 0 : i32
    %c0_i32_0 = arith.constant 0 : i32
    %c0_i32_1 = arith.constant 0 : i32
    %c0_i32_2 = arith.constant 0 : i32
    return %c0_i32, %c0_i32_0, %c0_i32_1 : i32, i32, i32
  }
  func.func @transform_2(%arg0: i32, %arg1: i32) -> (i32, i32, i32, i32) {
    %c0_i32 = arith.constant 0 : i32
    %c0_i32_0 = arith.constant 0 : i32
    %c0_i32_1 = arith.constant 0 : i32
    return %arg0, %arg1, %c0_i32, %c0_i32_0 : i32, i32, i32, i32
  }
}

</mosaic_0001>

<bundles_post_ra>
// kernel: upsample_block_forward.1
= control target key start
LH: loop header
LB: loop body
LE: loop exit
PB: predicated region body
PF: predicated region fallthrough
CT: control target
= control target key end

     0   :  { %s5318_s9 = smov 0   ;;  %s5320_s10 = smov 0   ;;  %s6146_s0 = inlined_call_operand.vmem [shape: bf16[2,42,8,130], index: 0, kind: input, shape index: {}]   ;;  %s6147_s1 = inlined_call_operand.vmem [shape: bf16[9,16,8], index: 1, kind: input, shape index: {}]   ;;  %s6148_s2 = inlined_call_operand.vmem [shape: f32[2,40,16,128], index: 2, kind: output, shape index: {}]  }
   0x1   :  { %s5322_s11 = smov 0   ;;  %s5324_s12 = smov 0  }
   0x2   :  { %s5326_s13 = smov 0  }
   0x3 LB: > { %s21_s14 = sadd.s32 1, %s5289_s11  ;;  %s24_s15 = sadd.s32 1, %s5293_s12  ;;  %s5297_s13 = sphi %s5326_s13, %s12_s13   ;;  %s5293_s12 = sphi %s5324_s12, %s6152_s12   ;;  %s5289_s11 = sphi %s5322_s11, %s6151_s11   ;;  %s5285_s10 = sphi %s5320_s10, %s6150_s10   ;;  %s5281_s9 = sphi %s5318_s9, %s6149_s9  }
   0x4   : > { %p22_p0 = scmp.ge.s32.totalorder %s21_s14, 5  ;;  %p4131_p1 = scmp.ge.s32.totalorder %s5297_s13, 1 }
   0x5   : > { %p126_p2 = scmp.lt.s32.totalorder %s5297_s13, 11 }
   0x6   : > { %s6154_s14 = smov (%p22_p0, %s21_s14), 0  ;;  %s6156_s15 = smov (!%p22_p0, %s24_s15), %s5293_s12 }
   0x7   : > { %p127_p3 = pnand %p4131_p1, %p126_p2  ;;  %p26_p4 = scmp.ge.s32.totalorder %s6156_s15, 2 }
   0x8   : > { %p153_p5 = scmp.lt.s32.totalorder (!%p127_p3), %s5285_s10, 1  ;;  %v5299_v0 = vmov (!%p127_p3), 0.0   ;;  %s4342_s17 = sshll.u32 (!%p127_p3), %s5281_s9, 6  ;;  %vm5300_vm0 = vmmov (!%p127_p3), 0   ;;  %vm215_vm1 = vcmask (!%p127_p3), 1039360   ;;  %vm221_vm2 = vcmask (!%p127_p3), 1043456  }
   0x9   : > { %s6158_s15 = smov (%p26_p4, %s6156_s15), 0  ;;  %130 = sbr.rel (%p127_p3) target bundleno = 771 (0x303), region = 28 }
   0xa   : > { %4496 = vmatprep.subr.bf16.mxu0 (!%p127_p3), %v5299_v0  ;;  %4550 = vmatprep.subr.bf16.mxu1 (!%p127_p3), %v5299_v0  ;;  %s5301_s22 = smov (!%p127_p3), 127   ;;  %s5302_s23 = smov (!%p127_p3), 126   ;;  %v5487_v30 = vld [vmem:[%s6147_s1 + $0x8] sm:$0xff] (!%p127_p3)   ;;  %vm217_vm3 = vcmask (!%p127_p3), 64512   ;;  %vm327_vm4 = vcmask (!%p127_p3), 1031168   ;;  %v5516_v39 = vld [vmem:[%s6147_s1] sm:$0xff] (!%p127_p3)  }
   0xb   : > { %4498 = vmatprep.mubr.msk.bf16.mxu0 (!%p127_p3), %vm5300_vm0, %v5299_v0  ;;  %4552 = vmatprep.mubr.msk.bf16.mxu1 (!%p127_p3), %vm5300_vm0, %v5299_v0  ;;  %v5537_v42 = vld [vmem:[%s6147_s1 + $0x10] sm:$0xff] (!%p127_p3)   ;;  %v5574_v53 = vld [vmem:[%s6147_s1 + $0x18] sm:$0xff] (!%p127_p3)   ;;  %v5601_v62 = vld [vmem:[%s6147_s1 + $0x20] sm:$0xff] (!%p127_p3)  }
  0x10   : > { %s6160_s10 = smov (!%p153_p5, %s5285_s10), 1 }
  0x11   : > { %s5184_s16 = smul.u32 336, %s6160_s10 }
  0x13   : > { %s157_s20 = scalar_lea.vmem %s6146_s0, %s5184_s16 }
  0x14   : > { %s5363_s21 = scalar_lea.vmem %s157_s20, %s4342_s17 }
  0x15   : > { %v5366_v1 = vld [vmem:[%s5363_s21 + $0x8] sm:$0xff]  ;;  %v5369_v2 = vld [vmem:[%s5363_s21] sm:$0xff]  ;;  %v5388_v7 = vld [vmem:[%s5363_s21 + $0x10] sm:$0xff] }
  0x16   : > { %v4186_v3 = vcombine.low %v5366_v1, %v5366_v1  ;;  %v4156_v4 = vcombine.low %v5369_v2, %v5369_v2  ;;  %v4187_v5 = vcombine.high %v5366_v1, %v5366_v1  ;;  %v4157_v6 = vcombine.high %v5369_v2, %v5369_v2  ;;  %v5403_v10 = vld [vmem:[%s5363_s21 + $0x18] sm:$0xff]  ;;  %v5426_v13 = vld [vmem:[%s5363_s21 + $0x20] sm:$0xff]  ;;  %v5441_v16 = vld [vmem:[%s5363_s21 + $0x28] sm:$0xff] }
  0x17   : > { %v4194_v8 = vcombine.high %v5388_v7, %v5388_v7  ;;  %v4193_v9 = vcombine.low %v5388_v7, %v5388_v7  ;;  %v4202_v11 = vcombine.high %v5403_v10, %v5403_v10  ;;  %v4201_v12 = vcombine.low %v5403_v10, %v5403_v10  ;;  %v5466_v21 = vld [vmem:[%s5363_s21 + $0x30] sm:$0xff]  ;;  %v5552_v46 = vld [vmem:[%s5363_s21 + $0x38] sm:$0xff] }
  0x18   : > { %750 = vrot.lane.b32.xlu1 %v4186_v3, %s5301_s22  ;;  %211 = vrot.lane.b32.xlu0 %v4156_v4, %s5301_s22  ;;  %v4238_v14 = vcombine.high %v5426_v13, %v5426_v13  ;;  %v4237_v15 = vcombine.low %v5426_v13, %v5426_v13  ;;  %v4246_v17 = vcombine.high %v5441_v16, %v5441_v16  ;;  %v275_v31 = vsel %vm221_vm2, %v5369_v2, 0  ;;  %v5626_v2 = vld [vmem:[%s6147_s1 + $0x28] sm:$0xff]  }
  0x19   : > { %v4245_v18 = vcombine.low %v5441_v16, %v5441_v16  ;;  %v5470_v22 = vcombine.high %v5466_v21, %v5466_v21  ;;  %v5474_v23 = vcombine.low %v5466_v21, %v5466_v21  ;;  %v800_v32 = vsel %vm221_vm2, %v5366_v1, 0 }
  0x1a   : > { %v5541_v43 = vsel %vm221_vm2, %v5388_v7, 0  ;;  %v5559_v47 = vcombine.high %v5552_v46, %v5552_v46  ;;  %v5563_v48 = vcombine.low %v5552_v46, %v5552_v46 }
  0x1c   : > { %752 = vrot.lane.b32.xlu1 %v4187_v5, %s5301_s22  ;;  %213 = vrot.lane.b32.xlu0 %v4157_v6, %s5301_s22 }
  0x20   : > { %325 = vrot.lane.b32.xlu1 %v4157_v6, %s5302_s23  ;;  %323 = vrot.lane.b32.xlu0 %v4156_v4, %s5302_s23 }
  0x24   : > { %845 = vrot.lane.b32.xlu1 %v4187_v5, %s5302_s23  ;;  %843 = vrot.lane.b32.xlu0 %v4186_v3, %s5302_s23 }
  0x28   : > { %449 = vrot.lane.b32.xlu1 %v4187_v5, %s5301_s22  ;;  %447 = vrot.lane.b32.xlu0 %v4186_v3, %s5301_s22 }
  0x2c   : > { %948 = vrot.lane.b32.xlu1 %v4194_v8, %s5301_s22  ;;  %946 = vrot.lane.b32.xlu0 %v4193_v9, %s5301_s22 }
  0x30   : > { %508 = vrot.lane.b32.xlu1 %v4187_v5, %s5302_s23  ;;  %506 = vrot.lane.b32.xlu0 %v4186_v3, %s5302_s23  ;;  %v5634_v3 = vsel %vm221_vm2, %v5403_v10, 0  ;;  %v5657_v10 = vld [vmem:[%s6147_s1 + $0x30] sm:$0xff]  }
  0x34   : > { %999 = vrot.lane.b32.xlu1 %v4194_v8, %s5302_s23  ;;  %997 = vrot.lane.b32.xlu0 %v4193_v9, %s5302_s23 }
  0x38   : > { %631 = vrot.lane.b32.xlu1 %v4194_v8, %s5301_s22  ;;  %629 = vrot.lane.b32.xlu0 %v4193_v9, %s5301_s22 }
  0x3c   : > { %1106 = vrot.lane.b32.xlu1 %v4202_v11, %s5301_s22  ;;  %1104 = vrot.lane.b32.xlu0 %v4201_v12, %s5301_s22 }
  0x40   : > { %690 = vrot.lane.b32.xlu1 %v4194_v8, %s5302_s23  ;;  %688 = vrot.lane.b32.xlu0 %v4193_v9, %s5302_s23 }
  0x44   : > { %1157 = vrot.lane.b32.xlu1 %v4202_v11, %s5302_s23  ;;  %1155 = vrot.lane.b32.xlu0 %v4201_v12, %s5302_s23 }
  0x48   : > { %1217 = vrot.lane.b32.xlu1 %v4194_v8, %s5301_s22  ;;  %1215 = vrot.lane.b32.xlu0 %v4193_v9, %s5301_s22 }
  0x4c   : > { %1682 = vrot.lane.b32.xlu1 %v4202_v11, %s5301_s22  ;;  %1680 = vrot.lane.b32.xlu0 %v4201_v12, %s5301_s22 }
  0x50   : > { %1310 = vrot.lane.b32.xlu1 %v4194_v8, %s5302_s23  ;;  %1308 = vrot.lane.b32.xlu0 %v4193_v9, %s5302_s23 }
  0x54   : > { %1775 = vrot.lane.b32.xlu1 %v4202_v11, %s5302_s23  ;;  %1773 = vrot.lane.b32.xlu0 %v4201_v12, %s5302_s23 }
  0x58   : > { %1413 = vrot.lane.b32.xlu1 %v4202_v11, %s5301_s22  ;;  %1411 = vrot.lane.b32.xlu0 %v4201_v12, %s5301_s22 }
  0x5c   : > { %1878 = vrot.lane.b32.xlu1 %v4238_v14, %s5301_s22  ;;  %1876 = vrot.lane.b32.xlu0 %v4237_v15, %s5301_s22 }
  0x60   : > { %1464 = vrot.lane.b32.xlu1 %v4202_v11, %s5302_s23  ;;  %1462 = vrot.lane.b32.xlu0 %v4201_v12, %s5302_s23 }
  0x64   : > { %1929 = vrot.lane.b32.xlu1 %v4238_v14, %s5302_s23  ;;  %1927 = vrot.lane.b32.xlu0 %v4237_v15, %s5302_s23 }
  0x68   : > { %1571 = vrot.lane.b32.xlu1 %v4238_v14, %s5301_s22  ;;  %1569 = vrot.lane.b32.xlu0 %v4237_v15, %s5301_s22 }
  0x6c   : > { %2036 = vrot.lane.b32.xlu1 %v4246_v17, %s5301_s22  ;;  %2034 = vrot.lane.b32.xlu0 %v4245_v18, %s5301_s22 }
  0x70   : > { %1622 = vrot.lane.b32.xlu1 %v4238_v14, %s5302_s23  ;;  %1620 = vrot.lane.b32.xlu0 %v4237_v15, %s5302_s23 }
  0x74   : > { %2087 = vrot.lane.b32.xlu1 %v4246_v17, %s5302_s23  ;;  %2085 = vrot.lane.b32.xlu0 %v4245_v18, %s5302_s23 }
  0x78   : > { %2147 = vrot.lane.b32.xlu1 %v4238_v14, %s5301_s22  ;;  %2145 = vrot.lane.b32.xlu0 %v4237_v15, %s5301_s22 }
  0x7c   : > { %2612 = vrot.lane.b32.xlu1 %v4246_v17, %s5301_s22  ;;  %2610 = vrot.lane.b32.xlu0 %v4245_v18, %s5301_s22 }
  0x80   : > { %2240 = vrot.lane.b32.xlu1 %v4238_v14, %s5302_s23  ;;  %2238 = vrot.lane.b32.xlu0 %v4237_v15, %s5302_s23 }
  0x84   : > { %2705 = vrot.lane.b32.xlu1 %v4246_v17, %s5302_s23  ;;  %2703 = vrot.lane.b32.xlu0 %v4245_v18, %s5302_s23 }
  0x88   : > { %2343 = vrot.lane.b32.xlu1 %v4246_v17, %s5301_s22  ;;  %2341 = vrot.lane.b32.xlu0 %v4245_v18, %s5301_s22 }
  0x8a   : > { %v751_v19 = vpop.permute.xlu1 %750  ;;  %v212_v20 = vpop.permute.xlu0 %211 }
  0x8c   : > { %2808 = vrot.lane.b32.xlu1 %v5470_v22, %s5301_s22  ;;  %2806 = vrot.lane.b32.xlu0 %v5474_v23, %s5301_s22 }
  0x8e   : > { %v753_v24 = vpop.permute.xlu1 %752  ;;  %v214_v25 = vpop.permute.xlu0 %213 }
  0x8f   : > { %v216_v26 = vsel %vm215_vm1, %v212_v20, %v214_v25  ;;  %v754_v27 = vsel %vm215_vm1, %v751_v19, %v753_v24 }
  0x90   : > { %v223_v28 = vsel %vm221_vm2, %v216_v26, 0  ;;  %v756_v29 = vsel %vm221_vm2, %v754_v27, 0  ;;  %2394 = vrot.lane.b32.xlu1 %v4246_v17, %s5302_s23  ;;  %2392 = vrot.lane.b32.xlu0 %v4245_v18, %s5302_s23 }
  0x91   : > { %4497 = vmatpush3.bf16.msra.mxu0 %v223_v28  ;;  %4551 = vmatpush3.bf16.msra.mxu1 %v756_v29 }
  0x92   : > { %4556 = vmatprep.subr.bf16.mxu1 %v5299_v0  ;;  %4502 = vmatprep.subr.bf16.mxu0 %v5299_v0  ;;  %v326_v33 = vpop.permute.xlu1 %325  ;;  %v324_v34 = vpop.permute.xlu0 %323 }
  0x93   : > { %v328_v37 = vsel %vm327_vm4, %v324_v34, %v326_v33 }
  0x94   : > { %4553 = vmatmul.mubr.msk.bf16.vlgmr.msra.gmra.mrb[0].mxu1 %vm217_vm3, %v5487_v30  ;;  %4499 = vmatmul.mubr.msk.bf16.vlgmr.msra.gmra.mrb[0].mxu0 %vm217_vm3, %v5487_v30  ;;  %v333_v40 = vsel %vm221_vm2, %v328_v37, 0 }
  0x95   : > { %4503 = vmatpush3.bf16.msra.mxu0 %v275_v31  ;;  %4557 = vmatpush3.bf16.msra.mxu1 %v800_v32 }
  0x96   : > { %4504 = vmatprep.mubr.msk.bf16.mxu0 %vm5300_vm0, %v5299_v0  ;;  %4508 = vmatprep.subr.bf16.mxu0 %v5299_v0  ;;  %v846_v35 = vpop.permute.xlu1 %845  ;;  %v844_v36 = vpop.permute.xlu0 %843 }
  0x97   : > { %4558 = vmatprep.mubr.msk.bf16.mxu1 %vm5300_vm0, %v5299_v0  ;;  %4562 = vmatprep.subr.bf16.mxu1 %v5299_v0  ;;  %v847_v38 = vsel %vm327_vm4, %v844_v36, %v846_v35  ;;  %v5704_v35 = vld [vmem:[%s5363_s21 + $0x40] sm:$0xff] }
  0x98   : > { %2859 = vrot.lane.b32.xlu1 %v5470_v22, %s5302_s23  ;;  %2857 = vrot.lane.b32.xlu0 %v5474_v23, %s5302_s23  ;;  %v849_v41 = vsel %vm221_vm2, %v847_v38, 0  ;;  %v4326_v36 = vcombine.high %v5704_v35, %v5704_v35  ;;  %v4325_v37 = vcombine.low %v5704_v35, %v5704_v35 }
  0x9a   : > { %v450_v44 = vpop.permute.xlu1 %449  ;;  %v448_v45 = vpop.permute.xlu0 %447 }
  0x9b   : > { %v451_v51 = vsel %vm215_vm1, %v448_v45, %v450_v44 }
  0x9c   : > { %2501 = vrot.lane.b32.xlu1 %v5470_v22, %s5301_s22  ;;  %2499 = vrot.lane.b32.xlu0 %v5474_v23, %s5301_s22  ;;  %v456_v54 = vsel %vm221_vm2, %v451_v51, 0 }
  0x9e   : > { %v949_v49 = vpop.permute.xlu1 %948  ;;  %v947_v50 = vpop.permute.xlu0 %946 }
  0x9f   : > { %v950_v52 = vsel %vm215_vm1, %v947_v50, %v949_v49 }
  0xa0   : > { %4505 = vmatmul.mubr.msk.bf16.vlgmr.msra.gmra.mrb[0].mxu0 %vm217_vm3, %v5516_v39  ;;  %4559 = vmatmul.mubr.msk.bf16.vlgmr.msra.gmra.mrb[0].mxu1 %vm217_vm3, %v5516_v39  ;;  %v952_v55 = vsel %vm221_vm2, %v950_v52, 0  ;;  %v5770_v52 = vld [vmem:[%s5363_s21 + $0x48] sm:$0xff]  ;;  %s4133_s21 = sshll.u32 %s5281_s9, 3  ;;  %s5185_s9 = smul.u32 80, %s6160_s10 }
  0xa1   : > { %4509 = vmatpush3.bf16.msra.mxu0 %v333_v40  ;;  %4563 = vmatpush3.bf16.msra.mxu1 %v849_v41  ;;  %p161_p6 = scmp.lt.s32.totalorder %s4133_s21, 39 }
  0xa2   : > { %4510 = vmatprep.mubr.msk.bf16.mxu0 %vm5300_vm0, %v5299_v0  ;;  %4564 = vmatprep.mubr.msk.bf16.mxu1 %vm5300_vm0, %v5299_v0  ;;  %v509_v56 = vpop.permute.xlu1 %508  ;;  %v507_v57 = vpop.permute.xlu0 %506 }
  0xa3   : > { %4514 = vmatprep.subr.bf16.mxu0 %v5299_v0  ;;  %4568 = vmatprep.subr.bf16.mxu1 %v5299_v0  ;;  %v510_v60 = vsel %vm327_vm4, %v507_v57, %v509_v56  ;;  %s6162_s21 = smov (!%p161_p6, %s4133_s21), 39 }
  0xa4   : > { %2966 = vrot.lane.b32.xlu1 %v5559_v47, %s5301_s22  ;;  %2964 = vrot.lane.b32.xlu0 %v5563_v48, %s5301_s22  ;;  %v515_v63 = vsel %vm221_vm2, %v510_v60, 0 }
  0xa6   : > { %v1000_v58 = vpop.permute.xlu1 %999  ;;  %v998_v59 = vpop.permute.xlu0 %997 }
  0xa7   : > { %v1001_v61 = vsel %vm327_vm4, %v998_v59, %v1000_v58 }
  0xa8   : > { %2552 = vrot.lane.b32.xlu1 %v5470_v22, %s5302_s23  ;;  %2550 = vrot.lane.b32.xlu0 %v5474_v23, %s5302_s23  ;;  %v1003_v1 = vsel %vm221_vm2, %v1001_v61, 0 }
  0xaa   : > { %v632_v4 = vpop.permute.xlu1 %631  ;;  %v630_v5 = vpop.permute.xlu0 %629 }
  0xab   : > { %v633_v8 = vsel %vm215_vm1, %v630_v5, %v632_v4 }
  0xac   : > { %4511 = vmatmul.mubr.msk.bf16.vlgmr.msra.gmra.mrb[0].mxu0 %vm217_vm3, %v5537_v42  ;;  %4565 = vmatmul.mubr.msk.bf16.vlgmr.msra.gmra.mrb[0].mxu1 %vm217_vm3, %v5537_v42  ;;  %v638_v11 = vsel %vm221_vm2, %v633_v8, 0  ;;  %v5815_v8 = vsel %vm221_vm2, %v5441_v16, 0 }
  0xad   : > { %4515 = vmatpush3.bf16.msra.mxu0 %v800_v32  ;;  %4569 = vmatpush3.bf16.msra.mxu1 %v5541_v43  ;;  %v5699_v32 = vld [vmem:[%s6147_s1 + $0x40] sm:$0xff]  }
  0xae   : > { %4516 = vmatprep.mubr.msk.bf16.mxu0 %vm5300_vm0, %v5299_v0  ;;  %4520 = vmatprep.subr.bf16.mxu0 %v5299_v0  ;;  %v1107_v6 = vpop.permute.xlu1 %1106  ;;  %v1105_v7 = vpop.permute.xlu0 %1104 }
  0xaf   : > { %4570 = vmatprep.mubr.msk.bf16.mxu1 %vm5300_vm0, %v5299_v0  ;;  %4574 = vmatprep.subr.bf16.mxu1 %v5299_v0  ;;  %v1108_v9 = vsel %vm215_vm1, %v1105_v7, %v1107_v6 }
  0xb0   : > { %3017 = vrot.lane.b32.xlu1 %v5559_v47, %s5302_s23  ;;  %3015 = vrot.lane.b32.xlu0 %v5563_v48, %s5302_s23  ;;  %v1110_v12 = vsel %vm221_vm2, %v1108_v9, 0 }
  0xb2   : > { %v691_v14 = vpop.permute.xlu1 %690  ;;  %v689_v15 = vpop.permute.xlu0 %688 }
  0xb3   : > { %v692_v19 = vsel %vm327_vm4, %v689_v15, %v691_v14 }
  0xb4   : > { %3077 = vrot.lane.b32.xlu1 %v5470_v22, %s5301_s22  ;;  %3075 = vrot.lane.b32.xlu0 %v5474_v23, %s5301_s22 }
  0xb6   : > { %v1158_v17 = vpop.permute.xlu1 %1157  ;;  %v1156_v18 = vpop.permute.xlu0 %1155 }
  0xb7   : > { %v1159_v20 = vsel %vm327_vm4, %v1156_v18, %v1158_v17 }
  0xb8   : > { %4517 = vmatmul.mubr.msk.bf16.vlgmr.msra.gmra.mrb[0].mxu0 %vm217_vm3, %v5574_v53  ;;  %4571 = vmatmul.mubr.msk.bf16.vlgmr.msra.gmra.mrb[0].mxu1 %vm217_vm3, %v5574_v53  ;;  %v1161_v24 = vsel %vm221_vm2, %v1159_v20, 0 }
  0xb9   : > { %4521 = vmatpush3.bf16.msra.mxu0 %v456_v54  ;;  %4575 = vmatpush3.bf16.msra.mxu1 %v952_v55  ;;  %v4333_v54 = vcombine.low %v5770_v52, %v5770_v52 }
  0xba   : > { %4522 = vmatprep.mubr.msk.bf16.mxu0 %vm5300_vm0, %v5299_v0  ;;  %4526 = vmatprep.subr.bf16.mxu0 %v5299_v0  ;;  %v1218_v25 = vpop.permute.xlu1 %1217  ;;  %v1216_v26 = vpop.permute.xlu0 %1215 }
  0xbb   : > { %4576 = vmatprep.mubr.msk.bf16.mxu1 %vm5300_vm0, %v5299_v0  ;;  %4580 = vmatprep.subr.bf16.mxu1 %v5299_v0  ;;  %v1219_v29 = vsel %vm215_vm1, %v1216_v26, %v1218_v25 }
  0xbc   : > { %3542 = vrot.lane.b32.xlu1 %v5559_v47, %s5301_s22  ;;  %3540 = vrot.lane.b32.xlu0 %v5563_v48, %s5301_s22  ;;  %v1221_v33 = vsel %vm221_vm2, %v1219_v29, 0 }
  0xbe   : > { %v1683_v27 = vpop.permute.xlu1 %1682  ;;  %v1681_v28 = vpop.permute.xlu0 %1680 }
  0xbf   : > { %v1684_v31 = vsel %vm215_vm1, %v1681_v28, %v1683_v27 }
  0xc0   : > { %3170 = vrot.lane.b32.xlu1 %v5470_v22, %s5302_s23  ;;  %3168 = vrot.lane.b32.xlu0 %v5474_v23, %s5302_s23  ;;  %v5680_v22 = vld [vmem:[%s6147_s1 + $0x38] sm:$0xff]   ;;  %v697_v23 = vsel %vm221_vm2, %v692_v19, 0  ;;  %v1686_v34 = vsel %vm221_vm2, %v1684_v31, 0 }
  0xc2   : > { %v1311_v38 = vpop.permute.xlu1 %1310  ;;  %v1309_v40 = vpop.permute.xlu0 %1308 }
  0xc4   : > { %4523 = vmatmul.mubr.msk.bf16.vlgmr.msra.gmra.mrb[0].mxu0 %vm217_vm3, %v5601_v62  ;;  %4577 = vmatmul.mubr.msk.bf16.vlgmr.msra.gmra.mrb[0].mxu1 %vm217_vm3, %v5601_v62 }
  0xc5   : > { %4527 = vmatpush3.bf16.msra.mxu0 %v515_v63  ;;  %4581 = vmatpush3.bf16.msra.mxu1 %v1003_v1 }
  0xc6   : > { %4528 = vmatprep.mubr.msk.bf16.mxu0 %vm5300_vm0, %v5299_v0  ;;  %4582 = vmatprep.mubr.msk.bf16.mxu1 %vm5300_vm0, %v5299_v0  ;;  %v1776_v41 = vpop.permute.xlu1 %1775  ;;  %v1774_v44 = vpop.permute.xlu0 %1773 }
  0xc7   : > { %4532 = vmatprep.subr.bf16.mxu0 %v5299_v0  ;;  %4586 = vmatprep.subr.bf16.mxu1 %v5299_v0  ;;  %v1777_v45 = vsel %vm327_vm4, %v1774_v44, %v1776_v41 }
  0xc8   : > { %3635 = vrot.lane.b32.xlu1 %v5559_v47, %s5302_s23  ;;  %3633 = vrot.lane.b32.xlu0 %v5563_v48, %s5302_s23  ;;  %v1779_v50 = vsel %vm221_vm2, %v1777_v45, 0 }
  0xca   : > { %v1412_v51 = vpop.permute.xlu0 %1411 }
  0xcc   : > { %3273 = vrot.lane.b32.xlu1 %v5559_v47, %s5301_s22  ;;  %3271 = vrot.lane.b32.xlu0 %v5563_v48, %s5301_s22 }
  0xce   : > { %v1877_v56 = vpop.permute.xlu0 %1876 }
  0xd0   : > { %4529 = vmatmul.mubr.msk.bf16.vlgmr.msra.gmra.mrb[0].mxu0 %vm217_vm3, %v5626_v2  ;;  %4583 = vmatmul.mubr.msk.bf16.vlgmr.msra.gmra.mrb[0].mxu1 %vm217_vm3, %v5626_v2 }
  0xd1   : > { %4533 = vmatpush3.bf16.msra.mxu0 %v5541_v43  ;;  %4587 = vmatpush3.bf16.msra.mxu1 %v5634_v3 }
  0xd2   : > { %4534 = vmatprep.mubr.msk.bf16.mxu0 %vm5300_vm0, %v5299_v0  ;;  %4538 = vmatprep.subr.bf16.mxu0 %v5299_v0  ;;  %v1463_v63 = vpop.permute.xlu0 %1462 }
  0xd3   : > { %4588 = vmatprep.mubr.msk.bf16.mxu1 %vm5300_vm0, %v5299_v0  ;;  %4592 = vmatprep.subr.bf16.mxu1 %v5299_v0 }
  0xd4   : > { %3738 = vrot.lane.b32.xlu1 %v4326_v36, %s5301_s22  ;;  %3736 = vrot.lane.b32.xlu0 %v4325_v37, %s5301_s22 }
  0xd8   : > { %3324 = vrot.lane.b32.xlu1 %v5559_v47, %s5302_s23  ;;  %3322 = vrot.lane.b32.xlu0 %v5563_v48, %s5302_s23  ;;  %v5758_v47 = vsel %vm221_vm2, %v5426_v13, 0  ;;  %v1414_v48 = vpop.permute.xlu1 %1413  ;;  %v4334_v13 = vcombine.high %v5770_v52, %v5770_v52 }
  0xd9   : > { %v1415_v57 = vsel %vm215_vm1, %v1412_v51, %v1414_v48  ;;  %v5899_v51 = vsel %vm221_vm2, %v5466_v21, 0 }
  0xda   : > { %v1417_v59 = vsel %vm221_vm2, %v1415_v57, 0 }
  0xdc   : > { %4535 = vmatmul.mubr.msk.bf16.vlgmr.msra.gmra.mrb[0].mxu0 %vm217_vm3, %v5657_v10  ;;  %4589 = vmatmul.mubr.msk.bf16.vlgmr.msra.gmra.mrb[0].mxu1 %vm217_vm3, %v5657_v10  ;;  %v1879_v55 = vpop.permute.xlu1 %1878 }
  0xdd   : > { %4539 = vmatpush3.bf16.msra.mxu0 %v638_v11  ;;  %4593 = vmatpush3.bf16.msra.mxu1 %v1110_v12  ;;  %v1880_v58 = vsel %vm215_vm1, %v1877_v56, %v1879_v55 }
  0xde   : > { %4540 = vmatprep.mubr.msk.bf16.mxu0 %vm5300_vm0, %v5299_v0  ;;  %4544 = vmatprep.subr.bf16.mxu0 %v5299_v0  ;;  %v1882_v60 = vsel %vm221_vm2, %v1880_v58, 0 }
  0xdf   : > { %4594 = vmatprep.mubr.msk.bf16.mxu1 %vm5300_vm0, %v5299_v0  ;;  %4598 = vmatprep.subr.bf16.mxu1 %v5299_v0 }
  0xe0   : > { %3789 = vrot.lane.b32.xlu1 %v4326_v36, %s5302_s23  ;;  %3787 = vrot.lane.b32.xlu0 %v4325_v37, %s5302_s23  ;;  %v1465_v61 = vpop.permute.xlu1 %1464 }
  0xe1   : > { %v1466_v4 = vsel %vm327_vm4, %v1463_v63, %v1465_v61 }
  0xe2   : > { %v1468_v6 = vsel %vm221_vm2, %v1466_v4, 0 }
  0xe4   : > { %3431 = vrot.lane.b32.xlu1 %v4326_v36, %s5301_s22  ;;  %3429 = vrot.lane.b32.xlu0 %v4325_v37, %s5301_s22  ;;  %v1930_v1 = vpop.permute.xlu1 %1929 }
  0xe8   : > { %4541 = vmatmul.mubr.msk.bf16.vlgmr.msra.gmra.mrb[0].mxu0 %vm217_vm3, %v5680_v22  ;;  %4595 = vmatmul.mubr.msk.bf16.vlgmr.msra.gmra.mrb[0].mxu1 %vm217_vm3, %v5680_v22  ;;  %v1572_v9 = vpop.permute.xlu1 %1571 }
  0xe9   : > { %4545 = vmatpush3.bf16.msra.mxu0 %v697_v23  ;;  %4599 = vmatpush3.bf16.msra.mxu1 %v1161_v24 }
  0xea   : > { %4546 = vmatprep.mubr.msk.bf16.mxu0 %vm5300_vm0, %v5299_v0  ;;  %4600 = vmatprep.mubr.msk.bf16.mxu1 %vm5300_vm0, %v5299_v0 }
  0xeb   : > { %4604 = vmatprep.subr.bf16.mxu0 %v5299_v0  ;;  %4658 = vmatprep.subr.bf16.mxu1 %v5299_v0 }
  0xec   : > { %3896 = vrot.lane.b32.xlu1 %v4334_v13, %s5301_s22  ;;  %3894 = vrot.lane.b32.xlu0 %v4333_v54, %s5301_s22  ;;  %v2037_v16 = vpop.permute.xlu1 %2036  ;;  %s4134_s22 = sshll.u32 %s6162_s21, 1 }
  0xf0   : > { %3482 = vrot.lane.b32.xlu1 %v4326_v36, %s5302_s23  ;;  %3480 = vrot.lane.b32.xlu0 %v4325_v37, %s5302_s23  ;;  %v1623_v19 = vpop.permute.xlu1 %1622 }
  0xf4   : > { %4547 = vmatmul.mubr.msk.bf16.vlgmr.msra.gmra.mrb[0].mxu0 %vm217_vm3, %v5699_v32  ;;  %4601 = vmatmul.mubr.msk.bf16.vlgmr.msra.gmra.mrb[0].mxu1 %vm217_vm3, %v5699_v32  ;;  %v2088_v23 = vpop.permute.xlu1 %2087 }
  0xf5   : > { %4605 = vmatpush3.bf16.msra.mxu0 %v1221_v33  ;;  %4659 = vmatpush3.bf16.msra.mxu1 %v1686_v34 }
  0xf6   : > { %4606 = vmatprep.mubr.msk.bf16.mxu0 %vm5300_vm0, %v5299_v0  ;;  %4660 = vmatprep.mubr.msk.bf16.mxu1 %vm5300_vm0, %v5299_v0 }
  0xf7   : > { %4610 = vmatprep.subr.bf16.mxu0 %v5299_v0  ;;  %4664 = vmatprep.subr.bf16.mxu1 %v5299_v0 }
  0xf8   : > { %3947 = vrot.lane.b32.xlu1 %v4334_v13, %s5302_s23  ;;  %3945 = vrot.lane.b32.xlu0 %v4333_v54, %s5302_s23  ;;  %v2148_v29 = vpop.permute.xlu1 %2147  ;;  %s165_s23 = sadd.s32 %s5185_s9, %s4134_s22 }
  0xf9   : > { %s4135_s24 = sshll.u32 %s165_s23, 3 }
  0xfa   : > { %s5998_s26 = scalar_lea.vmem %s6148_s2, %s4135_s24 }
  0xfc   : > { %4607 = vmatmul.mubr.msk.bf16.vlgmr.msra.gmra.mrb[4].mxu0 %vm217_vm3, %v5487_v30  ;;  %4661 = vmatmul.mubr.msk.bf16.vlgmr.msra.gmra.mrb[4].mxu1 %vm217_vm3, %v5487_v30  ;;  %v2613_v33 = vpop.permute.xlu1 %2612 }
  0xfd   : > { %4611 = vmatpush3.bf16.msra.mxu0 %v5541_v43  ;;  %4665 = vmatpush3.bf16.msra.mxu1 %v5634_v3  ;;  %v1312_v43 = vsel %vm327_vm4, %v1309_v40, %v1311_v38 }
  0xfe   : > { %4612 = vmatprep.mubr.msk.bf16.mxu0 %vm5300_vm0, %v5299_v0  ;;  %4616 = vmatprep.subr.bf16.mxu0 %v5299_v0  ;;  %v1314_v49 = vsel %vm221_vm2, %v1312_v43, 0 }
  0xff   : > { %4666 = vmatprep.mubr.msk.bf16.mxu1 %vm5300_vm0, %v5299_v0  ;;  %4670 = vmatprep.subr.bf16.mxu1 %v5299_v0 }
 0x100   : > { %v2241_v41 = vpop.permute.xlu1 %2240 }
 0x104   : > { %v2706_v43 = vpop.permute.xlu1 %2705 }
 0x108   : > { %4613 = vmatmul.mubr.msk.bf16.vlgmr.msra.gmra.mrb[4].mxu0 %vm217_vm3, %v5516_v39  ;;  %4667 = vmatmul.mubr.msk.bf16.vlgmr.msra.gmra.mrb[4].mxu1 %vm217_vm3, %v5516_v39  ;;  %v2344_v13 = vpop.permute.xlu1 %2343 }
 0x109   : > { %4617 = vmatpush3.bf16.msra.mxu0 %v1314_v49  ;;  %4671 = vmatpush3.bf16.msra.mxu1 %v1779_v50 }
 0x10a   : > { %4618 = vmatprep.mubr.msk.bf16.mxu0 %vm5300_vm0, %v5299_v0  ;;  %4672 = vmatprep.mubr.msk.bf16.mxu1 %vm5300_vm0, %v5299_v0 }
 0x10b   : > { %4622 = vmatprep.subr.bf16.mxu0 %v5299_v0  ;;  %4676 = vmatprep.subr.bf16.mxu1 %v5299_v0 }
 0x10c   : > { %v2809_v21 = vpop.permute.xlu1 %2808 }
 0x114   : > { %4619 = vmatmul.mubr.msk.bf16.vlgmr.msra.gmra.mrb[4].mxu0 %vm217_vm3, %v5537_v42  ;;  %4673 = vmatmul.mubr.msk.bf16.vlgmr.msra.gmra.mrb[4].mxu1 %vm217_vm3, %v5537_v42 }
 0x115   : > { %4623 = vmatpush3.bf16.msra.mxu0 %v5634_v3  ;;  %4677 = vmatpush3.bf16.msra.mxu1 %v5758_v47  ;;  %v1928_v3 = vpop.permute.xlu0 %1927 }
 0x116   : > { %4624 = vmatprep.mubr.msk.bf16.mxu0 %vm5300_vm0, %v5299_v0  ;;  %4628 = vmatprep.subr.bf16.mxu0 %v5299_v0  ;;  %v1931_v5 = vsel %vm327_vm4, %v1928_v3, %v1930_v1 }
 0x117   : > { %4678 = vmatprep.mubr.msk.bf16.mxu1 %vm5300_vm0, %v5299_v0  ;;  %4682 = vmatprep.subr.bf16.mxu1 %v5299_v0  ;;  %v1933_v7 = vsel %vm221_vm2, %v1931_v5, 0 }
 0x119   : > { %v1570_v11 = vpop.permute.xlu0 %1569 }
 0x11a   : > { %v1573_v14 = vsel %vm215_vm1, %v1570_v11, %v1572_v9 }
 0x11b   : > { %v1575_v17 = vsel %vm221_vm2, %v1573_v14, 0 }
 0x11d   : > { %v2035_v12 = vpop.permute.xlu0 %2034 }
 0x11e   : > { %v2038_v15 = vsel %vm215_vm1, %v2035_v12, %v2037_v16 }
 0x11f   : > { %v2040_v18 = vsel %vm221_vm2, %v2038_v15, 0 }
 0x120   : > { %4625 = vmatmul.mubr.msk.bf16.vlgmr.msra.gmra.mrb[4].mxu0 %vm217_vm3, %v5574_v53  ;;  %4679 = vmatmul.mubr.msk.bf16.vlgmr.msra.gmra.mrb[4].mxu1 %vm217_vm3, %v5574_v53 }
 0x121   : > { %4629 = vmatpush3.bf16.msra.mxu0 %v1417_v59  ;;  %4683 = vmatpush3.bf16.msra.mxu1 %v1882_v60  ;;  %v1621_v20 = vpop.permute.xlu0 %1620  ;;  %v2395_v60 = vpop.permute.xlu1 %2394 }
 0x122   : > { %4630 = vmatprep.mubr.msk.bf16.mxu0 %vm5300_vm0, %v5299_v0  ;;  %4634 = vmatprep.subr.bf16.mxu0 %v5299_v0  ;;  %v1624_v25 = vsel %vm327_vm4, %v1621_v20, %v1623_v19 }
 0x123   : > { %4684 = vmatprep.mubr.msk.bf16.mxu1 %vm5300_vm0, %v5299_v0  ;;  %4688 = vmatprep.subr.bf16.mxu1 %v5299_v0  ;;  %v1626_v27 = vsel %vm221_vm2, %v1624_v25, 0 }
 0x125   : > { %v2086_v24 = vpop.permute.xlu0 %2085  ;;  %v2860_v63 = vpop.permute.xlu1 %2859 }
 0x126   : > { %v2089_v26 = vsel %vm327_vm4, %v2086_v24, %v2088_v23 }
 0x127   : > { %v2091_v28 = vsel %vm221_vm2, %v2089_v26, 0 }
 0x129   : > { %v2146_v31 = vpop.permute.xlu0 %2145 }
 0x12a   : > { %v2149_v36 = vsel %vm215_vm1, %v2146_v31, %v2148_v29 }
 0x12b   : > { %v2151_v38 = vsel %vm221_vm2, %v2149_v36, 0 }
 0x12c   : > { %4631 = vmatmul.mubr.msk.bf16.vlgmr.msra.gmra.mrb[4].mxu0 %vm217_vm3, %v5601_v62  ;;  %4685 = vmatmul.mubr.msk.bf16.vlgmr.msra.gmra.mrb[4].mxu1 %vm217_vm3, %v5601_v62 }
 0x12d   : > { %4635 = vmatpush3.bf16.msra.mxu0 %v1468_v6  ;;  %4689 = vmatpush3.bf16.msra.mxu1 %v1933_v7  ;;  %v2611_v34 = vpop.permute.xlu0 %2610  ;;  %v5943_v7 = vsel %vm221_vm2, %v5552_v46, 0 }
 0x12e   : > { %4636 = vmatprep.mubr.msk.bf16.mxu0 %vm5300_vm0, %v5299_v0  ;;  %4690 = vmatprep.mubr.msk.bf16.mxu1 %vm5300_vm0, %v5299_v0  ;;  %v2614_v37 = vsel %vm215_vm1, %v2611_v34, %v2613_v33 }
 0x12f   : > { %4640 = vmatprep.subr.bf16.mxu0 %v5299_v0  ;;  %4694 = vmatprep.subr.bf16.mxu1 %v5299_v0  ;;  %v2616_v40 = vsel %vm221_vm2, %v2614_v37, 0 }
 0x131   : > { %v2239_v44 = vpop.permute.xlu0 %2238 }
 0x132   : > { %v2242_v49 = vsel %vm327_vm4, %v2239_v44, %v2241_v41 }
 0x135   : > { %v2704_v45 = vpop.permute.xlu0 %2703 }
 0x136   : > { %v2707_v50 = vsel %vm327_vm4, %v2704_v45, %v2706_v43 }
 0x137   : > { %v2709_v48 = vsel %vm221_vm2, %v2707_v50, 0 }
 0x138   : > { %4637 = vmatmul.mubr.msk.bf16.vlgmr.msra.gmra.mrb[4].mxu0 %vm217_vm3, %v5626_v2  ;;  %4691 = vmatmul.mubr.msk.bf16.vlgmr.msra.gmra.mrb[4].mxu1 %vm217_vm3, %v5626_v2 }
 0x139   : > { %4641 = vmatpush3.bf16.msra.mxu0 %v5758_v47  ;;  %4695 = vmatpush3.bf16.msra.mxu1 %v5815_v8  ;;  %v2342_v54 = vpop.permute.xlu0 %2341 }
 0x13a   : > { %4642 = vmatprep.mubr.msk.bf16.mxu0 %vm5300_vm0, %v5299_v0  ;;  %4646 = vmatprep.subr.bf16.mxu0 %v5299_v0  ;;  %v2345_v56 = vsel %vm215_vm1, %v2342_v54, %v2344_v13 }
 0x13b   : > { %4696 = vmatprep.mubr.msk.bf16.mxu1 %vm5300_vm0, %v5299_v0  ;;  %4700 = vmatprep.subr.bf16.mxu1 %v5299_v0  ;;  %v2347_v58 = vsel %vm221_vm2, %v2345_v56, 0  ;;  %v3686_v56 = vsel %vm221_vm2, %v5704_v35, 0 }
 0x13d   : > { %v2807_v55 = vpop.permute.xlu0 %2806 }
 0x13e   : > { %v2810_v57 = vsel %vm215_vm1, %v2807_v55, %v2809_v21 }
 0x13f   : > { %v2812_v59 = vsel %vm221_vm2, %v2810_v57, 0 }
 0x141   : > { %v2393_v61 = vpop.permute.xlu0 %2392 }
 0x142   : > { %v2396_v3 = vsel %vm327_vm4, %v2393_v61, %v2395_v60 }
 0x143   : > { %v2398_v5 = vsel %vm221_vm2, %v2396_v3, 0 }
 0x144   : > { %4643 = vmatmul.mubr.msk.bf16.vlgmr.msra.gmra.mrb[4].mxu0 %vm217_vm3, %v5657_v10  ;;  %4697 = vmatmul.mubr.msk.bf16.vlgmr.msra.gmra.mrb[4].mxu1 %vm217_vm3, %v5657_v10 }
 0x145   : > { %4647 = vmatpush3.bf16.msra.mxu0 %v1575_v17  ;;  %4701 = vmatpush3.bf16.msra.mxu1 %v2040_v18  ;;  %v2858_v1 = vpop.permute.xlu0 %2857 }
 0x146   : > { %4648 = vmatprep.mubr.msk.bf16.mxu0 %vm5300_vm0, %v5299_v0  ;;  %4652 = vmatprep.subr.bf16.mxu0 %v5299_v0  ;;  %v2861_v4 = vsel %vm327_vm4, %v2858_v1, %v2860_v63 }
 0x147   : > { %4702 = vmatprep.mubr.msk.bf16.mxu1 %vm5300_vm0, %v5299_v0  ;;  %4706 = vmatprep.subr.bf16.mxu1 %v5299_v0  ;;  %v2863_v6 = vsel %vm221_vm2, %v2861_v4, 0 }
 0x149   : > { %v2500_v9 = vpop.permute.xlu0 %2499 }
 0x14d   : > { %v2965_v11 = vpop.permute.xlu0 %2964 }
 0x150   : > { %4649 = vmatmul.mubr.msk.bf16.vlgmr.msra.gmra.mrb[4].mxu0 %vm217_vm3, %v5680_v22  ;;  %4703 = vmatmul.mubr.msk.bf16.vlgmr.msra.gmra.mrb[4].mxu1 %vm217_vm3, %v5680_v22 }
 0x151   : > { %4653 = vmatpush3.bf16.msra.mxu0 %v1626_v27  ;;  %4707 = vmatpush3.bf16.msra.mxu1 %v2091_v28  ;;  %v2551_v18 = vpop.permute.xlu0 %2550 }
 0x152   : > { %4654 = vmatprep.mubr.msk.bf16.mxu0 %vm5300_vm0, %v5299_v0  ;;  %4708 = vmatprep.mubr.msk.bf16.mxu1 %vm5300_vm0, %v5299_v0 }
 0x153   : > { %4712 = vmatprep.subr.bf16.mxu0 %v5299_v0  ;;  %4766 = vmatprep.subr.bf16.mxu1 %v5299_v0 }
 0x155   : > { %v3016_v20 = vpop.permute.xlu0 %3015 }
 0x159   : > { %v3076_v28 = vpop.permute.xlu0 %3075 }
 0x15c   : > { %4655 = vmatmul.mubr.msk.bf16.vlgmr.msra.gmra.mrb[4].mxu0 %vm217_vm3, %v5699_v32  ;;  %4709 = vmatmul.mubr.msk.bf16.vlgmr.msra.gmra.mrb[4].mxu1 %vm217_vm3, %v5699_v32 }
 0x15d   : > { %4713 = vmatpush3.bf16.msra.mxu0 %v2151_v38  ;;  %4767 = vmatpush3.bf16.msra.mxu1 %v2616_v40  ;;  %v3541_v31 = vpop.permute.xlu0 %3540 }
 0x15e   : > { %4714 = vmatprep.mubr.msk.bf16.mxu0 %vm5300_vm0, %v5299_v0  ;;  %4768 = vmatprep.mubr.msk.bf16.mxu1 %vm5300_vm0, %v5299_v0 }
 0x15f   : > { %4718 = vmatprep.subr.bf16.mxu0 %v5299_v0  ;;  %4772 = vmatprep.subr.bf16.mxu1 %v5299_v0 }
 0x161   : > { %v3169_v40 = vpop.permute.xlu0 %3168 }
 0x164   : > { %4715 = vmatmul.mubr.msk.bf16.vlgmr.msra.gmra.mrb[8].mxu0 %vm217_vm3, %v5487_v30  ;;  %4769 = vmatmul.mubr.msk.bf16.vlgmr.msra.gmra.mrb[8].mxu1 %vm217_vm3, %v5487_v30 }
 0x165   : > { %4719 = vmatpush3.bf16.msra.mxu0 %v5758_v47  ;;  %4773 = vmatpush3.bf16.msra.mxu1 %v5815_v8  ;;  %v2244_v47 = vsel %vm221_vm2, %v2242_v49, 0  ;;  %v3634_v54 = vpop.permute.xlu0 %3633 }
 0x166   : > { %4720 = vmatprep.mubr.msk.bf16.mxu0 %vm5300_vm0, %v5299_v0  ;;  %4724 = vmatprep.subr.bf16.mxu0 %v5299_v0 }
 0x167   : > { %4774 = vmatprep.mubr.msk.bf16.mxu1 %vm5300_vm0, %v5299_v0  ;;  %4778 = vmatprep.subr.bf16.mxu1 %v5299_v0 }
 0x170   : > { %4721 = vmatmul.mubr.msk.bf16.vlgmr.msra.gmra.mrb[8].mxu0 %vm217_vm3, %v5516_v39  ;;  %4775 = vmatmul.mubr.msk.bf16.vlgmr.msra.gmra.mrb[8].mxu1 %vm217_vm3, %v5516_v39 }
 0x171   : > { %4725 = vmatpush3.bf16.msra.mxu0 %v2244_v47  ;;  %4779 = vmatpush3.bf16.msra.mxu1 %v2709_v48 }
 0x172   : > { %4726 = vmatprep.mubr.msk.bf16.mxu0 %vm5300_vm0, %v5299_v0  ;;  %4780 = vmatprep.mubr.msk.bf16.mxu1 %vm5300_vm0, %v5299_v0 }
 0x173   : > { %4730 = vmatprep.subr.bf16.mxu0 %v5299_v0  ;;  %4784 = vmatprep.subr.bf16.mxu1 %v5299_v0 }
 0x17c   : > { %4727 = vmatmul.mubr.msk.bf16.vlgmr.msra.gmra.mrb[8].mxu0 %vm217_vm3, %v5537_v42  ;;  %4781 = vmatmul.mubr.msk.bf16.vlgmr.msra.gmra.mrb[8].mxu1 %vm217_vm3, %v5537_v42 }
 0x17d   : > { %4731 = vmatpush3.bf16.msra.mxu0 %v5815_v8  ;;  %4785 = vmatpush3.bf16.msra.mxu1 %v5899_v51  ;;  %v2502_v8 = vpop.permute.xlu1 %2501 }
 0x17e   : > { %4732 = vmatprep.mubr.msk.bf16.mxu0 %vm5300_vm0, %v5299_v0  ;;  %4736 = vmatprep.subr.bf16.mxu0 %v5299_v0  ;;  %v2503_v16 = vsel %vm215_vm1, %v2500_v9, %v2502_v8  ;;  %v3844_v8 = vsel %vm221_vm2, %v5770_v52, 0 }
 0x17f   : > { %4786 = vmatprep.mubr.msk.bf16.mxu1 %vm5300_vm0, %v5299_v0  ;;  %4790 = vmatprep.subr.bf16.mxu1 %v5299_v0  ;;  %v2505_v14 = vsel %vm221_vm2, %v2503_v16, 0 }
 0x181   : > { %v2967_v46 = vpop.permute.xlu1 %2966 }
 0x182   : > { %v2968_v12 = vsel %vm215_vm1, %v2965_v11, %v2967_v46 }
 0x183   : > { %v2970_v15 = vsel %vm221_vm2, %v2968_v12, 0 }
 0x185   : > { %v2553_v17 = vpop.permute.xlu1 %2552 }
 0x186   : > { %v2554_v23 = vsel %vm327_vm4, %v2551_v18, %v2553_v17 }
 0x187   : > { %v2556_v25 = vsel %vm221_vm2, %v2554_v23, 0 }
 0x188   : > { %4733 = vmatmul.mubr.msk.bf16.vlgmr.msra.gmra.mrb[8].mxu0 %vm217_vm3, %v5574_v53  ;;  %4787 = vmatmul.mubr.msk.bf16.vlgmr.msra.gmra.mrb[8].mxu1 %vm217_vm3, %v5574_v53 }
 0x189   : > { %4737 = vmatpush3.bf16.msra.mxu0 %v2347_v58  ;;  %4791 = vmatpush3.bf16.msra.mxu1 %v2812_v59  ;;  %v3018_v19 = vpop.permute.xlu1 %3017  ;;  %v3272_v58 = vpop.permute.xlu0 %3271 }
 0x18a   : > { %4738 = vmatprep.mubr.msk.bf16.mxu0 %vm5300_vm0, %v5299_v0  ;;  %4742 = vmatprep.subr.bf16.mxu0 %v5299_v0  ;;  %v3019_v24 = vsel %vm327_vm4, %v3016_v20, %v3018_v19 }
 0x18b   : > { %4792 = vmatprep.mubr.msk.bf16.mxu1 %vm5300_vm0, %v5299_v0  ;;  %4796 = vmatprep.subr.bf16.mxu1 %v5299_v0  ;;  %v3021_v26 = vsel %vm221_vm2, %v3019_v24, 0 }
 0x18d   : > { %v3078_v27 = vpop.permute.xlu1 %3077  ;;  %v3737_v35 = vpop.permute.xlu0 %3736 }
 0x18e   : > { %v3079_v33 = vsel %vm215_vm1, %v3076_v28, %v3078_v27 }
 0x18f   : > { %v3081_v36 = vsel %vm221_vm2, %v3079_v33, 0 }
 0x191   : > { %v3543_v29 = vpop.permute.xlu1 %3542  ;;  %v3323_v1 = vpop.permute.xlu0 %3322 }
 0x192   : > { %v3544_v34 = vsel %vm215_vm1, %v3541_v31, %v3543_v29 }
 0x193   : > { %v3546_v37 = vsel %vm221_vm2, %v3544_v34, 0 }
 0x194   : > { %4739 = vmatmul.mubr.msk.bf16.vlgmr.msra.gmra.mrb[8].mxu0 %vm217_vm3, %v5601_v62  ;;  %4793 = vmatmul.mubr.msk.bf16.vlgmr.msra.gmra.mrb[8].mxu1 %vm217_vm3, %v5601_v62 }
 0x195   : > { %4743 = vmatpush3.bf16.msra.mxu0 %v2398_v5  ;;  %4797 = vmatpush3.bf16.msra.mxu1 %v2863_v6  ;;  %v3171_v38 = vpop.permute.xlu1 %3170  ;;  %v3788_v4 = vpop.permute.xlu0 %3787 }
 0x196   : > { %4744 = vmatprep.mubr.msk.bf16.mxu0 %vm5300_vm0, %v5299_v0  ;;  %4798 = vmatprep.mubr.msk.bf16.mxu1 %vm5300_vm0, %v5299_v0  ;;  %v3172_v21 = vsel %vm327_vm4, %v3169_v40, %v3171_v38 }
 0x197   : > { %4748 = vmatprep.subr.bf16.mxu0 %v5299_v0  ;;  %4802 = vmatprep.subr.bf16.mxu1 %v5299_v0 }
 0x199   : > { %v3636_v13 = vpop.permute.xlu1 %3635  ;;  %v3430_v46 = vpop.permute.xlu0 %3429 }
 0x19d   : > { %v3274_v57 = vpop.permute.xlu1 %3273  ;;  %v3895_v52 = vpop.permute.xlu0 %3894 }
 0x19e   : > { %v3275_v59 = vsel %vm215_vm1, %v3272_v58, %v3274_v57 }
 0x1a0   : > { %4745 = vmatmul.mubr.msk.bf16.vlgmr.msra.gmra.mrb[8].mxu0 %vm217_vm3, %v5626_v2  ;;  %4799 = vmatmul.mubr.msk.bf16.vlgmr.msra.gmra.mrb[8].mxu1 %vm217_vm3, %v5626_v2 }
 0x1a1   : > { %4749 = vmatpush3.bf16.msra.mxu0 %v5899_v51  ;;  %4803 = vmatpush3.bf16.msra.mxu1 %v5943_v7 }
 0x1a2   : > { %4750 = vmatprep.mubr.msk.bf16.mxu0 %vm5300_vm0, %v5299_v0  ;;  %4754 = vmatprep.subr.bf16.mxu0 %v5299_v0 }
 0x1a3   : > { %4804 = vmatprep.mubr.msk.bf16.mxu1 %vm5300_vm0, %v5299_v0  ;;  %4808 = vmatprep.subr.bf16.mxu1 %v5299_v0 }
 0x1ac   : > { %4751 = vmatmul.mubr.msk.bf16.vlgmr.msra.gmra.mrb[8].mxu0 %vm217_vm3, %v5657_v10  ;;  %4805 = vmatmul.mubr.msk.bf16.vlgmr.msra.gmra.mrb[8].mxu1 %vm217_vm3, %v5657_v10 }
 0x1ad   : > { %4755 = vmatpush3.bf16.msra.mxu0 %v2505_v14  ;;  %4809 = vmatpush3.bf16.msra.mxu1 %v2970_v15  ;;  %v3481_v15 = vpop.permute.xlu0 %3480 }
 0x1ae   : > { %4756 = vmatprep.mubr.msk.bf16.mxu0 %vm5300_vm0, %v5299_v0  ;;  %4760 = vmatprep.subr.bf16.mxu0 %v5299_v0 }
 0x1af   : > { %4810 = vmatprep.mubr.msk.bf16.mxu1 %vm5300_vm0, %v5299_v0  ;;  %4814 = vmatprep.subr.bf16.mxu1 %v5299_v0 }
 0x1b1   : > { %v3946_v18 = vpop.permute.xlu0 %3945 }
 0x1b8   : > { %4757 = vmatmul.mubr.msk.bf16.vlgmr.msra.gmra.mrb[8].mxu0 %vm217_vm3, %v5680_v22  ;;  %4811 = vmatmul.mubr.msk.bf16.vlgmr.msra.gmra.mrb[8].mxu1 %vm217_vm3, %v5680_v22 }
 0x1b9   : > { %4761 = vmatpush3.bf16.msra.mxu0 %v2556_v25  ;;  %4815 = vmatpush3.bf16.msra.mxu1 %v3021_v26 }
 0x1ba   : > { %4762 = vmatprep.mubr.msk.bf16.mxu0 %vm5300_vm0, %v5299_v0  ;;  %4816 = vmatprep.mubr.msk.bf16.mxu1 %vm5300_vm0, %v5299_v0 }
 0x1bb   : > { %4820 = vmatprep.subr.bf16.mxu0 %v5299_v0  ;;  %4874 = vmatprep.subr.bf16.mxu1 %v5299_v0 }
 0x1c4   : > { %4763 = vmatmul.mubr.msk.bf16.vlgmr.msra.gmra.mrb[8].mxu0 %vm217_vm3, %v5699_v32  ;;  %4817 = vmatmul.mubr.msk.bf16.vlgmr.msra.gmra.mrb[8].mxu1 %vm217_vm3, %v5699_v32 }
 0x1c5   : > { %4821 = vmatpush3.bf16.msra.mxu0 %v3081_v36  ;;  %4875 = vmatpush3.bf16.msra.mxu1 %v3546_v37 }
 0x1c6   : > { %4822 = vmatprep.mubr.msk.bf16.mxu0 %vm5300_vm0, %v5299_v0  ;;  %4876 = vmatprep.mubr.msk.bf16.mxu1 %vm5300_vm0, %v5299_v0 }
 0x1c7   : > { %v733_v41 = vpop.f32.mrb[0].mxu0  ;;  %v1197_v44 = vpop.f32.mrb[0].mxu1  ;;  %4826 = vmatprep.subr.bf16.mxu0 %v5299_v0  ;;  %4880 = vmatprep.subr.bf16.mxu1 %v5299_v0 }
 0x1c8   : > { %742 = vst [vmem:[%s5998_s26] sm:$0xff] %v733_v41  ;;  %4205 = vst [vmem:[%s5998_s26 + $0x10] sm:$0xff] %v1197_v44  ;;  %v4548_v43 = vpop.f32.mrb[1].mxu0  ;;  %v4602_v45 = vpop.f32.mrb[1].mxu1 }
 0x1c9   : > { %v736_v49 = vpop.f32.mrb[2].mxu0  ;;  %v1200_v50 = vpop.f32.mrb[2].mxu1 }
 0x1ca   : > { %743 = vst [vmem:[%s5998_s26 + $0x8] sm:$0xff] %v736_v49  ;;  %4206 = vst [vmem:[%s5998_s26 + $0x18] sm:$0xff] %v1200_v50  ;;  %v4549_v47 = vpop.f32.mrb[3].mxu0  ;;  %v4603_v48 = vpop.f32.mrb[3].mxu1 }
 0x1cc   : > { %4823 = vmatmul.mubr.msk.bf16.vlgmr.msra.gmra.mrb[12].mxu0 %vm217_vm3, %v5487_v30  ;;  %4877 = vmatmul.mubr.msk.bf16.vlgmr.msra.gmra.mrb[12].mxu1 %vm217_vm3, %v5487_v30  ;;  %v3637_v30 = vsel %vm327_vm4, %v3634_v54, %v3636_v13 }
 0x1cd   : > { %4827 = vmatpush3.bf16.msra.mxu0 %v5899_v51  ;;  %4881 = vmatpush3.bf16.msra.mxu1 %v5943_v7  ;;  %v3174_v51 = vsel %vm221_vm2, %v3172_v21, 0  ;;  %v3639_v55 = vsel %vm221_vm2, %v3637_v30, 0 }
 0x1ce   : > { %4828 = vmatprep.mubr.msk.bf16.mxu0 %vm5300_vm0, %v5299_v0  ;;  %4832 = vmatprep.subr.bf16.mxu0 %v5299_v0 }
 0x1cf   : > { %4882 = vmatprep.mubr.msk.bf16.mxu1 %vm5300_vm0, %v5299_v0  ;;  %4886 = vmatprep.subr.bf16.mxu1 %v5299_v0 }
 0x1d8   : > { %4829 = vmatmul.mubr.msk.bf16.vlgmr.msra.gmra.mrb[12].mxu0 %vm217_vm3, %v5516_v39  ;;  %4883 = vmatmul.mubr.msk.bf16.vlgmr.msra.gmra.mrb[12].mxu1 %vm217_vm3, %v5516_v39  ;;  %v3739_v39 = vpop.permute.xlu1 %3738 }
 0x1d9   : > { %4833 = vmatpush3.bf16.msra.mxu0 %v3174_v51  ;;  %4887 = vmatpush3.bf16.msra.mxu1 %v3639_v55  ;;  %v3740_v60 = vsel %vm215_vm1, %v3737_v35, %v3739_v39 }
 0x1da   : > { %4834 = vmatprep.mubr.msk.bf16.mxu0 %vm5300_vm0, %v5299_v0  ;;  %4888 = vmatprep.mubr.msk.bf16.mxu1 %vm5300_vm0, %v5299_v0  ;;  %v3742_v61 = vsel %vm221_vm2, %v3740_v60, 0 }
 0x1db   : > { %4838 = vmatprep.subr.bf16.mxu0 %v5299_v0  ;;  %4892 = vmatprep.subr.bf16.mxu1 %v5299_v0 }
 0x1dc   : > { %v3325_v63 = vpop.permute.xlu1 %3324 }
 0x1dd   : > { %v3326_v5 = vsel %vm327_vm4, %v3323_v1, %v3325_v63 }
 0x1e0   : > { %v3790_v3 = vpop.permute.xlu1 %3789 }
 0x1e1   : > { %v3791_v6 = vsel %vm327_vm4, %v3788_v4, %v3790_v3 }
 0x1e4   : > { %4835 = vmatmul.mubr.msk.bf16.vlgmr.msra.gmra.mrb[12].mxu0 %vm217_vm3, %v5537_v42  ;;  %4889 = vmatmul.mubr.msk.bf16.vlgmr.msra.gmra.mrb[12].mxu1 %vm217_vm3, %v5537_v42  ;;  %v3277_v42 = vsel %vm221_vm2, %v3275_v59, 0  ;;  %v3432_v9 = vpop.permute.xlu1 %3431 }
 0x1e5   : > { %4839 = vmatpush3.bf16.msra.mxu0 %v5943_v7  ;;  %4893 = vmatpush3.bf16.msra.mxu1 %v3686_v56  ;;  %v3793_v7 = vsel %vm221_vm2, %v3791_v6, 0  ;;  %v3433_v11 = vsel %vm215_vm1, %v3430_v46, %v3432_v9 }
 0x1e6   : > { %4840 = vmatprep.mubr.msk.bf16.mxu0 %vm5300_vm0, %v5299_v0  ;;  %4844 = vmatprep.subr.bf16.mxu0 %v5299_v0 }
 0x1e7   : > { %4894 = vmatprep.mubr.msk.bf16.mxu1 %vm5300_vm0, %v5299_v0  ;;  %4898 = vmatprep.subr.bf16.mxu1 %v5299_v0 }
 0x1f0   : > { %4841 = vmatmul.mubr.msk.bf16.vlgmr.msra.gmra.mrb[12].mxu0 %vm217_vm3, %v5574_v53  ;;  %4895 = vmatmul.mubr.msk.bf16.vlgmr.msra.gmra.mrb[12].mxu1 %vm217_vm3, %v5574_v53  ;;  %v3328_v53 = vsel %vm221_vm2, %v3326_v5, 0 }
 0x1f1   : > { %4845 = vmatpush3.bf16.msra.mxu0 %v3277_v42  ;;  %4899 = vmatpush3.bf16.msra.mxu1 %v3742_v61 }
 0x1f2   : > { %4846 = vmatprep.mubr.msk.bf16.mxu0 %vm5300_vm0, %v5299_v0  ;;  %4850 = vmatprep.subr.bf16.mxu0 %v5299_v0 }
 0x1f3   : > { %4900 = vmatprep.mubr.msk.bf16.mxu1 %vm5300_vm0, %v5299_v0  ;;  %4904 = vmatprep.subr.bf16.mxu1 %v5299_v0 }
 0x1fc   : > { %4847 = vmatmul.mubr.msk.bf16.vlgmr.msra.gmra.mrb[12].mxu0 %vm217_vm3, %v5601_v62  ;;  %4901 = vmatmul.mubr.msk.bf16.vlgmr.msra.gmra.mrb[12].mxu1 %vm217_vm3, %v5601_v62  ;;  %v3897_v62 = vpop.permute.xlu1 %3896 }
 0x1fd   : > { %4851 = vmatpush3.bf16.msra.mxu0 %v3328_v53  ;;  %4905 = vmatpush3.bf16.msra.mxu1 %v3793_v7  ;;  %v3898_v16 = vsel %vm215_vm1, %v3895_v52, %v3897_v62 }
 0x1fe   : > { %4852 = vmatprep.mubr.msk.bf16.mxu0 %vm5300_vm0, %v5299_v0  ;;  %4906 = vmatprep.mubr.msk.bf16.mxu1 %vm5300_vm0, %v5299_v0  ;;  %v3900_v12 = vsel %vm221_vm2, %v3898_v16, 0 }
 0x1ff   : > { %4856 = vmatprep.subr.bf16.mxu0 %v5299_v0  ;;  %4910 = vmatprep.subr.bf16.mxu1 %v5299_v0 }
 0x200   : > { %v3483_v14 = vpop.permute.xlu1 %3482 }
 0x201   : > { %v3484_v19 = vsel %vm327_vm4, %v3481_v15, %v3483_v14 }
 0x202   : > { %v3486_v20 = vsel %vm221_vm2, %v3484_v19, 0 }
 0x204   : > { %v3948_v17 = vpop.permute.xlu1 %3947 }
 0x208   : > { %4853 = vmatmul.mubr.msk.bf16.vlgmr.msra.gmra.mrb[12].mxu0 %vm217_vm3, %v5626_v2  ;;  %4907 = vmatmul.mubr.msk.bf16.vlgmr.msra.gmra.mrb[12].mxu1 %vm217_vm3, %v5626_v2  ;;  %v3435_v2 = vsel %vm221_vm2, %v3433_v11, 0 }
 0x209   : > { %4857 = vmatpush3.bf16.msra.mxu0 %v3686_v56  ;;  %4911 = vmatpush3.bf16.msra.mxu1 %v3844_v8 }
 0x20a   : > { %4858 = vmatprep.mubr.msk.bf16.mxu0 %vm5300_vm0, %v5299_v0  ;;  %4862 = vmatprep.subr.bf16.mxu0 %v5299_v0 }
 0x20b   : > { %4912 = vmatprep.mubr.msk.bf16.mxu1 %vm5300_vm0, %v5299_v0  ;;  %4916 = vmatprep.subr.bf16.mxu1 %v5299_v0 }
 0x214   : > { %4859 = vmatmul.mubr.msk.bf16.vlgmr.msra.gmra.mrb[12].mxu0 %vm217_vm3, %v5657_v10  ;;  %4913 = vmatmul.mubr.msk.bf16.vlgmr.msra.gmra.mrb[12].mxu1 %vm217_vm3, %v5657_v10  ;;  %v3949_v10 = vsel %vm327_vm4, %v3946_v18, %v3948_v17 }
 0x215   : > { %4863 = vmatpush3.bf16.msra.mxu0 %v3435_v2  ;;  %4917 = vmatpush3.bf16.msra.mxu1 %v3900_v12  ;;  %v3951_v23 = vsel %vm221_vm2, %v3949_v10, 0 }
 0x216   : > { %4864 = vmatprep.mubr.msk.bf16.mxu0 %vm5300_vm0, %v5299_v0  ;;  %4868 = vmatprep.subr.bf16.mxu0 %v5299_v0 }
 0x217   : > { %4918 = vmatprep.mubr.msk.bf16.mxu1 %vm5300_vm0, %v5299_v0  ;;  %4922 = vmatprep.subr.bf16.mxu1 %v5299_v0 }
 0x220   : > { %4865 = vmatmul.mubr.msk.bf16.vlgmr.msra.gmra.mrb[12].mxu0 %vm217_vm3, %v5680_v22  ;;  %4919 = vmatmul.mubr.msk.bf16.vlgmr.msra.gmra.mrb[12].mxu1 %vm217_vm3, %v5680_v22 }
 0x221   : > { %4869 = vmatpush3.bf16.msra.mxu0 %v3486_v20  ;;  %4923 = vmatpush3.bf16.msra.mxu1 %v3951_v23 }
 0x222   : > { %4870 = vmatprep.mubr.msk.bf16.mxu0 %vm5300_vm0, %v5299_v0  ;;  %4924 = vmatprep.mubr.msk.bf16.mxu1 %vm5300_vm0, %v5299_v0 }
 0x22c   : > { %4871 = vmatmul.mubr.msk.bf16.vlgmr.msra.gmra.mrb[12].mxu0 %vm217_vm3, %v5699_v32  ;;  %4925 = vmatmul.mubr.msk.bf16.vlgmr.msra.gmra.mrb[12].mxu1 %vm217_vm3, %v5699_v32 }
 0x22f   : > { %v1662_v24 = vpop.f32.mrb[4].mxu0  ;;  %v2127_v25 = vpop.f32.mrb[4].mxu1 }
 0x230   : > { %4227 = vst [vmem:[%s5998_s26 + $0x20] sm:$0xff] %v1662_v24  ;;  %4249 = vst [vmem:[%s5998_s26 + $0x30] sm:$0xff] %v2127_v25  ;;  %v4656_v22 = vpop.f32.mrb[5].mxu0  ;;  %v4710_v26 = vpop.f32.mrb[5].mxu1 }
 0x231   : > { %v1665_v27 = vpop.f32.mrb[6].mxu0  ;;  %v2130_v28 = vpop.f32.mrb[6].mxu1 }
 0x232   : > { %4228 = vst [vmem:[%s5998_s26 + $0x28] sm:$0xff] %v1665_v27  ;;  %4250 = vst [vmem:[%s5998_s26 + $0x38] sm:$0xff] %v2130_v28  ;;  %v4657_v0 = vpop.f32.mrb[7].mxu0  ;;  %v4711_v29 = vpop.f32.mrb[7].mxu1 }
 0x297   : > { %v2592_v31 = vpop.f32.mrb[8].mxu0  ;;  %v3057_v33 = vpop.f32.mrb[8].mxu1 }
 0x298   : > { %4271 = vst [vmem:[%s5998_s26 + $0x40] sm:$0xff] %v2592_v31  ;;  %4293 = vst [vmem:[%s5998_s26 + $0x50] sm:$0xff] %v3057_v33  ;;  %v4764_v32 = vpop.f32.mrb[9].mxu0  ;;  %v4818_v34 = vpop.f32.mrb[9].mxu1 }
 0x299   : > { %v2595_v36 = vpop.f32.mrb[10].mxu0  ;;  %v3060_v37 = vpop.f32.mrb[10].mxu1 }
 0x29a   : > { %4272 = vst [vmem:[%s5998_s26 + $0x48] sm:$0xff] %v2595_v36  ;;  %4294 = vst [vmem:[%s5998_s26 + $0x58] sm:$0xff] %v3060_v37  ;;  %v4765_v38 = vpop.f32.mrb[11].mxu0  ;;  %v4819_v40 = vpop.f32.mrb[11].mxu1 }
 0x2ff   : > { %v3522_v41 = vpop.f32.mrb[12].mxu0  ;;  %v3987_v44 = vpop.f32.mrb[12].mxu1 }
 0x300   : > { %4315 = vst [vmem:[%s5998_s26 + $0x60] sm:$0xff] %v3522_v41  ;;  %4337 = vst [vmem:[%s5998_s26 + $0x70] sm:$0xff] %v3987_v44  ;;  %v4872_v43 = vpop.f32.mrb[13].mxu0  ;;  %v4926_v45 = vpop.f32.mrb[13].mxu1 }
 0x301   : > { %v3525_v49 = vpop.f32.mrb[14].mxu0  ;;  %v3990_v50 = vpop.f32.mrb[14].mxu1 }
 0x302   : > { %4316 = vst [vmem:[%s5998_s26 + $0x68] sm:$0xff] %v3525_v49  ;;  %4338 = vst [vmem:[%s5998_s26 + $0x78] sm:$0xff] %v3990_v50  ;;  %v4873_v47 = vpop.f32.mrb[15].mxu0  ;;  %v4927_v48 = vpop.f32.mrb[15].mxu1 }
 0x303 PF: > { %s12_s13 = sadd.s32 1, %s5297_s13   ;;  %s6149_s9 = smov %s5289_s11 }
 0x304   : > { %p9_p7 = scmp.ge.s32.totalorder %s12_s13, 12   ;;  %s6150_s10 = smov %s5293_s12 }
 0x305   : > { %s6151_s11 = smov %s6154_s14  ;;  %s6152_s12 = smov %s6158_s15 }
 0x306   :  { %11 = sbr.rel (!%p9_p7) target bundleno = 3 (0x3), region = 83 }

</bundles_post_ra>
